<compile_context>
chip_gen: v5e
topology: v5e:2x2
jax: 0.10.0
libtpu: 0.0.40
codegen_flags: <defaults>
</compile_context>

<pallas_src>
import jax
import jax.numpy as jnp
from jax import lax
from jax.experimental import pallas as pl
from jax.experimental.pallas import tpu as pltpu

# ---------------- static model config (small, consistent with the module) ----
VOCAB = 16          # tokenizer.n_tokens
PAD_IDX = 0         # tokenizer.char_to_int[pad]
EMB = 32            # emb_size
HID = 32            # hidden_size
NUM_LAYERS = 2      # num_layers
LATENT = 16         # latent_size
BIDIRECTIONAL = True
BATCH = 8           # > 1 so PyTorch's .squeeze() is a no-op
SEQ = 8


# ---------------------------- Pallas kernel ----------------------------------
def make_encoder_kernel(B, T, V, H, Z):
    """2-layer bidirectional GRU encoder + fused latent projection."""
    TB = T * B

    def gates(gi, gh, h_prev, b_hn, w):
        # column layout of gi/gh: (r | z | n), each block `w` wide; h_prev (B, w)
        r = jax.nn.sigmoid(gi[:, 0:w] + gh[:, 0:w])
        z = jax.nn.sigmoid(gi[:, w:2 * w] + gh[:, w:2 * w])
        n = jnp.tanh(gi[:, 2 * w:3 * w] + r * (gh[:, 2 * w:3 * w] + b_hn))
        return (1.0 - z) * n + z * h_prev

    def kernel(ids_ref, w0p_ref, b0p_ref, whh0_ref, bhh0n_ref,
               wih1f_ref, b1f_ref, whh1f_ref, bhh1fn_ref,
               wih1b_ref, b1b_ref, bhh1bn_ref,
               wlat_ref, blat_ref,
               y_ref,
               gi0_buf, h_buf, gi1_buf):
        # ---- embedding + layer-0 input projection, both directions paired ----
        # one-hot pair: cols [0:V) select token at time t (fwd), [V:2V) select
        # token at time T-1-t (bwd).  Embedding table already folded into w0p.
        ids = ids_ref[...]                                    # (TB, 2) int32
        idf = ids[:, 0:1]
        idr = ids[:, 1:2]
        col = lax.broadcasted_iota(jnp.int32, (TB, 2 * V), 1)
        onehot = (col == jnp.where(col < V, idf, idr + V)).astype(jnp.float32)
        gi0_buf[...] = (jnp.dot(onehot, w0p_ref[...],
                                preferred_element_type=jnp.float32)
                        + b0p_ref[...])                        # (TB, 6H)

        # ---- layer 0: fused fwd/bwd recurrence (unrolled, block-diag W_hh) ---
        # hidden layout: h = [h_fwd | h_bwd]  (B, 2H)
        # gi/gh column layout: (r_f, r_b, z_f, z_b, n_f, n_b)
        b_hn0 = jnp.broadcast_to(bhh0n_ref[...], (B, 2 * H))   # hoisted broadcast
        w_hh0 = whh0_ref[...]                                  # hoisted weight load
        h = jnp.zeros((B, 2 * H), jnp.float32)
        for t in range(T):                                     # fully unrolled
            gi = gi0_buf[t * B:(t + 1) * B, :]                 # (B, 6H)
            gh = jnp.dot(h, w_hh0,
                         preferred_element_type=jnp.float32)   # single MXU pass
            h = gates(gi, gh, h, b_hn0, 2 * H)
            h_buf[t * B:(t + 1) * B, 0:H] = h[:, 0:H]              # fwd @ t
            h_buf[(T - 1 - t) * B:(T - t) * B, H:2 * H] = h[:, H:2 * H]  # bwd @ T-1-t

        # ---- layer 1 (last layer): hoisted input projection for fwd dir ------
        gi1_buf[...] = (jnp.dot(h_buf[...], wih1f_ref[...],
                                preferred_element_type=jnp.float32)
                        + b1f_ref[...])                        # (TB, 3H)

        # ---- layer 1 forward recurrence (only final hidden needed) -----------
        b_hn1f = jnp.broadcast_to(bhh1fn_ref[...], (B, H))
        w_hh1f = whh1f_ref[...]                                # hoisted weight load
        hf = jnp.zeros((B, H), jnp.float32)
        for t in range(T):                                     # fully unrolled
            gi = gi1_buf[t * B:(t + 1) * B, :]
            gh = jnp.dot(hf, w_hh1f,
                         preferred_element_type=jnp.float32)
            hf = gates(gi, gh, hf, b_hn1f, H)

        # ---- layer 1 backward: single step from zero state at t = T-1 --------
        gi_b = (jnp.dot(h_buf[(T - 1) * B:T * B, :], wih1b_ref[...],
                        preferred_element_type=jnp.float32)
                + b1b_ref[...])                                # (B, 3H)
        r_b = jax.nn.sigmoid(gi_b[:, 0:H])
        z_b = jax.nn.sigmoid(gi_b[:, H:2 * H])
        n_b = jnp.tanh(gi_b[:, 2 * H:3 * H] + r_b * bhh1bn_ref[...])
        hb = (1.0 - z_b) * n_b                                 # h_prev == 0

        # ---- bidirectional sum + fused latent projection (mu | logvar) -------
        out = hf + hb
        y_ref[...] = (jnp.dot(out, wlat_ref[...],
                              preferred_element_type=jnp.float32)
                      + blat_ref[...])                          # (B, 2Z)

    return kernel


# ------------------------------ wrapper ---------------------------------------
def encoder_rnn_pallas(params, inputs):
    """inputs: int32 token ids [B, T].  Returns (mu, logvar), each [B, Z]."""
    B, T = inputs.shape
    V, E, H, L, Z = VOCAB, EMB, HID, NUM_LAYERS, LATENT
    f32 = jnp.float32
    assert L == 2  # TODO(synk): generalize the fused-direction kernel to num_layers > 2

    # token ids, time-major + time-reversed copy (tiny int glue; no f32 gather)
    tok_tm = jnp.transpose(inputs, (1, 0)).astype(jnp.int32)          # (T, B)
    ids_pair = jnp.stack(
        [tok_tm.reshape(-1), tok_tm[::-1].reshape(-1)], axis=1)       # (T*B, 2)

    def interleave(af, ab):
        """(.., 3H) x2 -> (.., 6H), column order (r_f, r_b, z_f, z_b, n_f, n_b)."""
        return jnp.concatenate(
            [af[..., 0:H], ab[..., 0:H],
             af[..., H:2 * H], ab[..., H:2 * H],
             af[..., 2 * H:3 * H], ab[..., 2 * H:3 * H]], axis=-1)

    def fold_bias(b_ih, b_hh):
        """Fold b_ih (all) + b_hh (r, z) into the gi bias; keep b_hh_n apart."""
        b_gi = b_ih.astype(f32) + jnp.concatenate(
            [b_hh[:2 * H].astype(f32), jnp.zeros((H,), f32)])
        return b_gi.reshape(1, 3 * H), b_hh[2 * H:].astype(f32).reshape(1, H)

    emb = params["emb"].astype(f32)

    # ---- layer 0: embedding folded into the paired (fwd|bwd) input projection
    (w_ih0f, w_hh0f, b_ih0f, b_hh0f), (w_ih0b, w_hh0b, b_ih0b, b_hh0b) = params["gru"][0]
    z3 = jnp.zeros((V, 3 * H), f32)
    w0_pair = jnp.concatenate(
        [interleave(emb @ w_ih0f.T.astype(f32), z3),
         interleave(z3, emb @ w_ih0b.T.astype(f32))], axis=0)         # (2V, 6H)
    b0f_gi, b0f_hn = fold_bias(b_ih0f, b_hh0f)
    b0b_gi, b0b_hn = fold_bias(b_ih0b, b_hh0b)
    b0_gi_pair = interleave(b0f_gi, b0b_gi)                           # (1, 6H)
    zH = jnp.zeros((H, 3 * H), f32)
    w_hh0_bd = jnp.concatenate(
        [interleave(w_hh0f.T.astype(f32), zH),
         interleave(zH, w_hh0b.T.astype(f32))], axis=0)               # (2H, 6H) block-diag
    b_hh0_n = jnp.concatenate([b0f_hn, b0b_hn], axis=-1)              # (1, 2H)

    # ---- layer 1 (last layer) ----
    (w_ih1f, w_hh1f, b_ih1f, b_hh1f), (w_ih1b, _w_hh1b, b_ih1b, b_hh1b) = params["gru"][1]
    b1f_gi, b1f_hn = fold_bias(b_ih1f, b_hh1f)
    b1b_gi, b1b_hn = fold_bias(b_ih1b, b_hh1b)   # bwd: only 1 step from zero state

    # ---- fused latent projection (mu | logvar) ----
    w_lat = jnp.concatenate([params["w_mu"].T, params["w_lv"].T], axis=1).astype(f32)
    b_lat = jnp.concatenate([params["b_mu"], params["b_lv"]]).reshape(1, 2 * Z).astype(f32)

    flat_inputs = [
        ids_pair, w0_pair, b0_gi_pair, w_hh0_bd, b_hh0_n,
        w_ih1f.T.astype(f32), b1f_gi, w_hh1f.T.astype(f32), b1f_hn,
        w_ih1b.T.astype(f32), b1b_gi, b1b_hn,
        w_lat, b_lat,
    ]

    vmem = pl.BlockSpec(memory_space=pltpu.MemorySpace.VMEM)
    kernel = make_encoder_kernel(B, T, V, H, Z)

    y = pl.pallas_call(
        kernel,
        out_shape=jax.ShapeDtypeStruct((B, 2 * Z), jnp.float32),
        in_specs=[vmem] * len(flat_inputs),
        out_specs=vmem,
        scratch_shapes=[
            pltpu.VMEM((T * B, 6 * H), jnp.float32),   # paired layer-0 gi
            pltpu.VMEM((T * B, 2 * H), jnp.float32),   # layer-0 [fwd|bwd] outputs
            pltpu.VMEM((T * B, 3 * H), jnp.float32),   # layer-1 fwd gi
        ],
    )(*flat_inputs)
    return y[:, :Z], y[:, Z:]


# ------------------------------ params / reference ----------------------------
def init_params(key):
    keys = iter(jax.random.split(key, 64))
    emb = jax.random.normal(next(keys), (VOCAB, EMB), jnp.float32) * 0.1
    emb = emb.at[PAD_IDX].set(0.0)                     # padding_idx row = 0
    gru = []
    for l in range(NUM_LAYERS):
        in_size = EMB if l == 0 else 2 * HID
        dirs = []
        for _d in range(2):
            w_ih = jax.random.normal(next(keys), (3 * HID, in_size), jnp.float32) * 0.1
            w_hh = jax.random.normal(next(keys), (3 * HID, HID), jnp.float32) * 0.1
            b_ih = jax.random.normal(next(keys), (3 * HID,), jnp.float32) * 0.1
            b_hh = jax.random.normal(next(keys), (3 * HID,), jnp.float32) * 0.1
            dirs.append((w_ih, w_hh, b_ih, b_hh))
        gru.append(dirs)
    w_mu = jax.random.normal(next(keys), (LATENT, HID), jnp.float32) * 0.1
    b_mu = jax.random.normal(next(keys), (LATENT,), jnp.float32) * 0.1
    w_lv = jax.random.normal(next(keys), (LATENT, HID), jnp.float32) * 0.1
    b_lv = jax.random.normal(next(keys), (LATENT,), jnp.float32) * 0.1
    return {"emb": emb, "gru": gru, "w_mu": w_mu, "b_mu": b_mu,
            "w_lv": w_lv, "b_lv": b_lv}


def reference_forward(params, inputs):
    """Pure-JAX replica of the PyTorch forward (for correctness check)."""
    H = HID
    x = params["emb"][inputs]                          # (B, T, E)
    B, T, _ = x.shape

    def step(x_t, h, p):
        w_ih, w_hh, b_ih, b_hh = p
        gi = x_t @ w_ih.T + b_ih
        gh = h @ w_hh.T + b_hh
        r = jax.nn.sigmoid(gi[:, :H] + gh[:, :H])
        z = jax.nn.sigmoid(gi[:, H:2 * H] + gh[:, H:2 * H])
        n = jnp.tanh(gi[:, 2 * H:] + r * gh[:, 2 * H:])
        return (1.0 - z) * n + z * h

    for l in range(NUM_LAYERS):
        p_f, p_b = params["gru"][l]
        h = jnp.zeros((B, H), jnp.float32)
        hs_f = []
        for t in range(T):
            h = step(x[:, t], h, p_f)
            hs_f.append(h)
        h = jnp.zeros((B, H), jnp.float32)
        hs_b = [None] * T
        for t in range(T - 1, -1, -1):
            h = step(x[:, t], h, p_b)
            hs_b[t] = h
        x = jnp.concatenate([jnp.stack(hs_f, 1), jnp.stack(hs_b, 1)], axis=-1)

    out = x[:, -1, :]
    out = out[:, :H] + out[:, H:]
    mu = out @ params["w_mu"].T + params["b_mu"]
    logvar = out @ params["w_lv"].T + params["b_lv"]
    return mu, logvar


# ------------------------------ main ------------------------------------------
if __name__ == "__main__":
    key = jax.random.PRNGKey(0)
    k_par, k_tok = jax.random.split(key)
    params = init_params(k_par)
    # deterministic small batch of "SMILES token ids" [B, T]
    inputs = jax.random.randint(k_tok, (BATCH, SEQ), 0, VOCAB, dtype=jnp.int32)

    mu, logvar = jax.jit(encoder_rnn_pallas)(params, inputs)
    mu = jax.block_until_ready(mu)
    logvar = jax.block_until_ready(logvar)

    mu_ref, lv_ref = reference_forward(params, inputs)
    assert mu.shape == (BATCH, LATENT) and logvar.shape == (BATCH, LATENT)
    assert jnp.allclose(mu, mu_ref, atol=5e-3, rtol=5e-3)
    assert jnp.allclose(logvar, lv_ref, atol=5e-3, rtol=5e-3)

    print("KERNEL_OK")
</pallas_src>

<mosaic_0001>
module attributes {stable_mosaic.version = 11 : i64} {
  func.func @kernel(%arg0: memref<64x2xi32, #tpu.memory_space<vmem>>, %arg1: memref<32x192xf32, #tpu.memory_space<vmem>>, %arg2: memref<1x192xf32, #tpu.memory_space<vmem>>, %arg3: memref<64x192xf32, #tpu.memory_space<vmem>>, %arg4: memref<1x64xf32, #tpu.memory_space<vmem>>, %arg5: memref<64x96xf32, #tpu.memory_space<vmem>>, %arg6: memref<1x96xf32, #tpu.memory_space<vmem>>, %arg7: memref<32x96xf32, #tpu.memory_space<vmem>>, %arg8: memref<1x32xf32, #tpu.memory_space<vmem>>, %arg9: memref<64x96xf32, #tpu.memory_space<vmem>>, %arg10: memref<1x96xf32, #tpu.memory_space<vmem>>, %arg11: memref<1x32xf32, #tpu.memory_space<vmem>>, %arg12: memref<32x32xf32, #tpu.memory_space<vmem>>, %arg13: memref<1x32xf32, #tpu.memory_space<vmem>>, %arg14: memref<8x32xf32, #tpu.memory_space<vmem>>, %arg15: memref<64x192xf32, #tpu.memory_space<vmem>>, %arg16: memref<64x64xf32, #tpu.memory_space<vmem>>, %arg17: memref<64x96xf32, #tpu.memory_space<vmem>>) attributes {dimension_semantics = [], scalar_prefetch = 0 : i64, scratch_operands = 3 : i64, tpu.core_type = #tpu.core_type<tc>} {
    %c0 = arith.constant 0 : index
    %c0_0 = arith.constant 0 : index
    %0 = vector.load %arg0[%c0, %c0_0] : memref<64x2xi32, #tpu.memory_space<vmem>>, vector<64x2xi32>
    %1 = vector.extract_strided_slice %0 {offsets = [0, 0], sizes = [64, 1], strides = [1, 1]} : vector<64x2xi32> to vector<64x1xi32>
    %2 = vector.extract_strided_slice %0 {offsets = [0, 1], sizes = [64, 1], strides = [1, 1]} : vector<64x2xi32> to vector<64x1xi32>
    %3 = tpu.iota {dimensions = array<i32: 1>} : vector<64x32xi32>
    %c16_i32 = arith.constant 16 : i32
    %4 = vector.broadcast %c16_i32 : i32 to vector<64x32xi32>
    %5 = arith.cmpi slt, %3, %4 : vector<64x32xi32>
    %c16_i32_1 = arith.constant 16 : i32
    %6 = vector.broadcast %c16_i32_1 : i32 to vector<64x1xi32>
    %7 = arith.addi %2, %6 : vector<64x1xi32>
    %8 = vector.shape_cast %1 : vector<64x1xi32> to vector<64x1xi32>
    %9 = vector.broadcast %8 : vector<64x1xi32> to vector<64x32xi32>
    %10 = vector.shape_cast %7 : vector<64x1xi32> to vector<64x1xi32>
    %11 = vector.broadcast %10 : vector<64x1xi32> to vector<64x32xi32>
    %12 = arith.select %5, %9, %11 : vector<64x32xi1>, vector<64x32xi32>
    %13 = arith.cmpi eq, %3, %12 : vector<64x32xi32>
    %14 = arith.extui %13 : vector<64x32xi1> to vector<64x32xi32>
    %15 = arith.sitofp %14 : vector<64x32xi32> to vector<64x32xf32>
    %c0_2 = arith.constant 0 : index
    %c0_3 = arith.constant 0 : index
    %16 = vector.load %arg1[%c0_2, %c0_3] : memref<32x192xf32, #tpu.memory_space<vmem>>, vector<32x192xf32>
    %cst = arith.constant dense<0.000000e+00> : vector<64x192xf32>
    %17 = tpu.matmul %15, %16, %cst {dimension_numbers = #tpu.dot_dimension_numbers<[1], [0], [0], [1], [0, 0, 1, 1], [], []>} : vector<64x32xf32>, vector<32x192xf32>, vector<64x192xf32> -> vector<64x192xf32>
    %c0_4 = arith.constant 0 : index
    %c0_5 = arith.constant 0 : index
    %18 = vector.load %arg2[%c0_4, %c0_5] : memref<1x192xf32, #tpu.memory_space<vmem>>, vector<1x192xf32>
    %19 = vector.broadcast %18 : vector<1x192xf32> to vector<64x192xf32>
    %20 = arith.addf %17, %19 : vector<64x192xf32>
    %c0_6 = arith.constant 0 : index
    %c0_7 = arith.constant 0 : index
    %21 = vector.load %arg15[%c0_6, %c0_7] : memref<64x192xf32, #tpu.memory_space<vmem>>, vector<64x192xf32>
    tpu.vector_store %arg15[%c0_6, %c0_7], %20 {strides = array<i32>} : memref<64x192xf32, #tpu.memory_space<vmem>>, vector<64x192xf32>,
    %c0_8 = arith.constant 0 : index
    %c0_9 = arith.constant 0 : index
    %22 = vector.load %arg4[%c0_8, %c0_9] : memref<1x64xf32, #tpu.memory_space<vmem>>, vector<1x64xf32>
    %23 = vector.shape_cast %22 : vector<1x64xf32> to vector<1x64xf32>
    %24 = vector.broadcast %23 : vector<1x64xf32> to vector<8x64xf32>
    %c0_10 = arith.constant 0 : index
    %c0_11 = arith.constant 0 : index
    %25 = vector.load %arg3[%c0_10, %c0_11] : memref<64x192xf32, #tpu.memory_space<vmem>>, vector<64x192xf32>
    %cst_12 = arith.constant 0.000000e+00 : f32
    %26 = vector.broadcast %cst_12 : f32 to vector<8x64xf32>
    %c0_13 = arith.constant 0 : index
    %c0_14 = arith.constant 0 : index
    %27 = vector.load %arg15[%c0_13, %c0_14] : memref<64x192xf32, #tpu.memory_space<vmem>>, vector<8x192xf32>
    %cst_15 = arith.constant dense<0.000000e+00> : vector<8x192xf32>
    %28 = tpu.matmul %26, %25, %cst_15 {dimension_numbers = #tpu.dot_dimension_numbers<[1], [0], [0], [1], [0, 0, 1, 1], [], []>} : vector<8x64xf32>, vector<64x192xf32>, vector<8x192xf32> -> vector<8x192xf32>
    %29 = vector.extract_strided_slice %27 {offsets = [0, 0], sizes = [8, 64], strides = [1, 1]} : vector<8x192xf32> to vector<8x64xf32>
    %30 = vector.extract_strided_slice %28 {offsets = [0, 0], sizes = [8, 64], strides = [1, 1]} : vector<8x192xf32> to vector<8x64xf32>
    %31 = arith.addf %29, %30 : vector<8x64xf32>
    %32 = arith.negf %31 : vector<8x64xf32>
    %33 = math.exp %32 : vector<8x64xf32>
    %cst_16 = arith.constant 1.000000e+00 : f32
    %34 = vector.broadcast %cst_16 : f32 to vector<8x64xf32>
    %35 = arith.addf %34, %33 : vector<8x64xf32>
    %36 = arith.divf %34, %35 : vector<8x64xf32>
    %37 = vector.extract_strided_slice %27 {offsets = [0, 64], sizes = [8, 64], strides = [1, 1]} : vector<8x192xf32> to vector<8x64xf32>
    %38 = vector.extract_strided_slice %28 {offsets = [0, 64], sizes = [8, 64], strides = [1, 1]} : vector<8x192xf32> to vector<8x64xf32>
    %39 = arith.addf %37, %38 : vector<8x64xf32>
    %40 = arith.negf %39 : vector<8x64xf32>
    %41 = math.exp %40 : vector<8x64xf32>
    %cst_17 = arith.constant 1.000000e+00 : f32
    %42 = vector.broadcast %cst_17 : f32 to vector<8x64xf32>
    %43 = arith.addf %42, %41 : vector<8x64xf32>
    %44 = arith.divf %42, %43 : vector<8x64xf32>
    %45 = vector.extract_strided_slice %27 {offsets = [0, 128], sizes = [8, 64], strides = [1, 1]} : vector<8x192xf32> to vector<8x64xf32>
    %46 = vector.extract_strided_slice %28 {offsets = [0, 128], sizes = [8, 64], strides = [1, 1]} : vector<8x192xf32> to vector<8x64xf32>
    %47 = arith.addf %46, %24 : vector<8x64xf32>
    %48 = arith.mulf %36, %47 : vector<8x64xf32>
    %49 = arith.addf %45, %48 : vector<8x64xf32>
    %50 = math.tanh %49 : vector<8x64xf32>
    %cst_18 = arith.constant 1.000000e+00 : f32
    %51 = vector.broadcast %cst_18 : f32 to vector<8x64xf32>
    %52 = arith.subf %51, %44 : vector<8x64xf32>
    %53 = arith.mulf %52, %50 : vector<8x64xf32>
    %54 = arith.mulf %44, %26 : vector<8x64xf32>
    %55 = arith.addf %53, %54 : vector<8x64xf32>
    %56 = vector.extract_strided_slice %55 {offsets = [0, 0], sizes = [8, 32], strides = [1, 1]} : vector<8x64xf32> to vector<8x32xf32>
    %c0_19 = arith.constant 0 : index
    %c0_20 = arith.constant 0 : index
    %57 = vector.load %arg16[%c0_19, %c0_20] : memref<64x64xf32, #tpu.memory_space<vmem>>, vector<8x32xf32>
    tpu.vector_store %arg16[%c0_19, %c0_20], %56 {strides = array<i32>} : memref<64x64xf32, #tpu.memory_space<vmem>>, vector<8x32xf32>,
    %58 = vector.extract_strided_slice %55 {offsets = [0, 32], sizes = [8, 32], strides = [1, 1]} : vector<8x64xf32> to vector<8x32xf32>
    %c56 = arith.constant 56 : index
    %c32 = arith.constant 32 : index
    %59 = vector.load %arg16[%c56, %c32] : memref<64x64xf32, #tpu.memory_space<vmem>>, vector<8x32xf32>
    tpu.vector_store %arg16[%c56, %c32], %58 {strides = array<i32>} : memref<64x64xf32, #tpu.memory_space<vmem>>, vector<8x32xf32>,
    %c8 = arith.constant 8 : index
    %c0_21 = arith.constant 0 : index
    %60 = vector.load %arg15[%c8, %c0_21] : memref<64x192xf32, #tpu.memory_space<vmem>>, vector<8x192xf32>
    %cst_22 = arith.constant dense<0.000000e+00> : vector<8x192xf32>
    %61 = tpu.matmul %55, %25, %cst_22 {dimension_numbers = #tpu.dot_dimension_numbers<[1], [0], [0], [1], [0, 0, 1, 1], [], []>} : vector<8x64xf32>, vector<64x192xf32>, vector<8x192xf32> -> vector<8x192xf32>
    %62 = vector.extract_strided_slice %60 {offsets = [0, 0], sizes = [8, 64], strides = [1, 1]} : vector<8x192xf32> to vector<8x64xf32>
    %63 = vector.extract_strided_slice %61 {offsets = [0, 0], sizes = [8, 64], strides = [1, 1]} : vector<8x192xf32> to vector<8x64xf32>
    %64 = arith.addf %62, %63 : vector<8x64xf32>
    %65 = arith.negf %64 : vector<8x64xf32>
    %66 = math.exp %65 : vector<8x64xf32>
    %cst_23 = arith.constant 1.000000e+00 : f32
    %67 = vector.broadcast %cst_23 : f32 to vector<8x64xf32>
    %68 = arith.addf %67, %66 : vector<8x64xf32>
    %69 = arith.divf %67, %68 : vector<8x64xf32>
    %70 = vector.extract_strided_slice %60 {offsets = [0, 64], sizes = [8, 64], strides = [1, 1]} : vector<8x192xf32> to vector<8x64xf32>
    %71 = vector.extract_strided_slice %61 {offsets = [0, 64], sizes = [8, 64], strides = [1, 1]} : vector<8x192xf32> to vector<8x64xf32>
    %72 = arith.addf %70, %71 : vector<8x64xf32>
    %73 = arith.negf %72 : vector<8x64xf32>
    %74 = math.exp %73 : vector<8x64xf32>
    %cst_24 = arith.constant 1.000000e+00 : f32
    %75 = vector.broadcast %cst_24 : f32 to vector<8x64xf32>
    %76 = arith.addf %75, %74 : vector<8x64xf32>
    %77 = arith.divf %75, %76 : vector<8x64xf32>
    %78 = vector.extract_strided_slice %60 {offsets = [0, 128], sizes = [8, 64], strides = [1, 1]} : vector<8x192xf32> to vector<8x64xf32>
    %79 = vector.extract_strided_slice %61 {offsets = [0, 128], sizes = [8, 64], strides = [1, 1]} : vector<8x192xf32> to vector<8x64xf32>
    %80 = arith.addf %79, %24 : vector<8x64xf32>
    %81 = arith.mulf %69, %80 : vector<8x64xf32>
    %82 = arith.addf %78, %81 : vector<8x64xf32>
    %83 = math.tanh %82 : vector<8x64xf32>
    %cst_25 = arith.constant 1.000000e+00 : f32
    %84 = vector.broadcast %cst_25 : f32 to vector<8x64xf32>
    %85 = arith.subf %84, %77 : vector<8x64xf32>
    %86 = arith.mulf %85, %83 : vector<8x64xf32>
    %87 = arith.mulf %77, %55 : vector<8x64xf32>
    %88 = arith.addf %86, %87 : vector<8x64xf32>
    %89 = vector.extract_strided_slice %88 {offsets = [0, 0], sizes = [8, 32], strides = [1, 1]} : vector<8x64xf32> to vector<8x32xf32>
    %c8_26 = arith.constant 8 : index
    %c0_27 = arith.constant 0 : index
    %90 = vector.load %arg16[%c8_26, %c0_27] : memref<64x64xf32, #tpu.memory_space<vmem>>, vector<8x32xf32>
    tpu.vector_store %arg16[%c8_26, %c0_27], %89 {strides = array<i32>} : memref<64x64xf32, #tpu.memory_space<vmem>>, vector<8x32xf32>,
    %91 = vector.extract_strided_slice %88 {offsets = [0, 32], sizes = [8, 32], strides = [1, 1]} : vector<8x64xf32> to vector<8x32xf32>
    %c48 = arith.constant 48 : index
    %c32_28 = arith.constant 32 : index
    %92 = vector.load %arg16[%c48, %c32_28] : memref<64x64xf32, #tpu.memory_space<vmem>>, vector<8x32xf32>
    tpu.vector_store %arg16[%c48, %c32_28], %91 {strides = array<i32>} : memref<64x64xf32, #tpu.memory_space<vmem>>, vector<8x32xf32>,
    %c16 = arith.constant 16 : index
    %c0_29 = arith.constant 0 : index
    %93 = vector.load %arg15[%c16, %c0_29] : memref<64x192xf32, #tpu.memory_space<vmem>>, vector<8x192xf32>
    %cst_30 = arith.constant dense<0.000000e+00> : vector<8x192xf32>
    %94 = tpu.matmul %88, %25, %cst_30 {dimension_numbers = #tpu.dot_dimension_numbers<[1], [0], [0], [1], [0, 0, 1, 1], [], []>} : vector<8x64xf32>, vector<64x192xf32>, vector<8x192xf32> -> vector<8x192xf32>
    %95 = vector.extract_strided_slice %93 {offsets = [0, 0], sizes = [8, 64], strides = [1, 1]} : vector<8x192xf32> to vector<8x64xf32>
    %96 = vector.extract_strided_slice %94 {offsets = [0, 0], sizes = [8, 64], strides = [1, 1]} : vector<8x192xf32> to vector<8x64xf32>
    %97 = arith.addf %95, %96 : vector<8x64xf32>
    %98 = arith.negf %97 : vector<8x64xf32>
    %99 = math.exp %98 : vector<8x64xf32>
    %cst_31 = arith.constant 1.000000e+00 : f32
    %100 = vector.broadcast %cst_31 : f32 to vector<8x64xf32>
    %101 = arith.addf %100, %99 : vector<8x64xf32>
    %102 = arith.divf %100, %101 : vector<8x64xf32>
    %103 = vector.extract_strided_slice %93 {offsets = [0, 64], sizes = [8, 64], strides = [1, 1]} : vector<8x192xf32> to vector<8x64xf32>
    %104 = vector.extract_strided_slice %94 {offsets = [0, 64], sizes = [8, 64], strides = [1, 1]} : vector<8x192xf32> to vector<8x64xf32>
    %105 = arith.addf %103, %104 : vector<8x64xf32>
    %106 = arith.negf %105 : vector<8x64xf32>
    %107 = math.exp %106 : vector<8x64xf32>
    %cst_32 = arith.constant 1.000000e+00 : f32
    %108 = vector.broadcast %cst_32 : f32 to vector<8x64xf32>
    %109 = arith.addf %108, %107 : vector<8x64xf32>
    %110 = arith.divf %108, %109 : vector<8x64xf32>
    %111 = vector.extract_strided_slice %93 {offsets = [0, 128], sizes = [8, 64], strides = [1, 1]} : vector<8x192xf32> to vector<8x64xf32>
    %112 = vector.extract_strided_slice %94 {offsets = [0, 128], sizes = [8, 64], strides = [1, 1]} : vector<8x192xf32> to vector<8x64xf32>
    %113 = arith.addf %112, %24 : vector<8x64xf32>
    %114 = arith.mulf %102, %113 : vector<8x64xf32>
    %115 = arith.addf %111, %114 : vector<8x64xf32>
    %116 = math.tanh %115 : vector<8x64xf32>
    %cst_33 = arith.constant 1.000000e+00 : f32
    %117 = vector.broadcast %cst_33 : f32 to vector<8x64xf32>
    %118 = arith.subf %117, %110 : vector<8x64xf32>
    %119 = arith.mulf %118, %116 : vector<8x64xf32>
    %120 = arith.mulf %110, %88 : vector<8x64xf32>
    %121 = arith.addf %119, %120 : vector<8x64xf32>
    %122 = vector.extract_strided_slice %121 {offsets = [0, 0], sizes = [8, 32], strides = [1, 1]} : vector<8x64xf32> to vector<8x32xf32>
    %c16_34 = arith.constant 16 : index
    %c0_35 = arith.constant 0 : index
    %123 = vector.load %arg16[%c16_34, %c0_35] : memref<64x64xf32, #tpu.memory_space<vmem>>, vector<8x32xf32>
    tpu.vector_store %arg16[%c16_34, %c0_35], %122 {strides = array<i32>} : memref<64x64xf32, #tpu.memory_space<vmem>>, vector<8x32xf32>,
    %124 = vector.extract_strided_slice %121 {offsets = [0, 32], sizes = [8, 32], strides = [1, 1]} : vector<8x64xf32> to vector<8x32xf32>
    %c40 = arith.constant 40 : index
    %c32_36 = arith.constant 32 : index
    %125 = vector.load %arg16[%c40, %c32_36] : memref<64x64xf32, #tpu.memory_space<vmem>>, vector<8x32xf32>
    tpu.vector_store %arg16[%c40, %c32_36], %124 {strides = array<i32>} : memref<64x64xf32, #tpu.memory_space<vmem>>, vector<8x32xf32>,
    %c24 = arith.constant 24 : index
    %c0_37 = arith.constant 0 : index
    %126 = vector.load %arg15[%c24, %c0_37] : memref<64x192xf32, #tpu.memory_space<vmem>>, vector<8x192xf32>
    %cst_38 = arith.constant dense<0.000000e+00> : vector<8x192xf32>
    %127 = tpu.matmul %121, %25, %cst_38 {dimension_numbers = #tpu.dot_dimension_numbers<[1], [0], [0], [1], [0, 0, 1, 1], [], []>} : vector<8x64xf32>, vector<64x192xf32>, vector<8x192xf32> -> vector<8x192xf32>
    %128 = vector.extract_strided_slice %126 {offsets = [0, 0], sizes = [8, 64], strides = [1, 1]} : vector<8x192xf32> to vector<8x64xf32>
    %129 = vector.extract_strided_slice %127 {offsets = [0, 0], sizes = [8, 64], strides = [1, 1]} : vector<8x192xf32> to vector<8x64xf32>
    %130 = arith.addf %128, %129 : vector<8x64xf32>
    %131 = arith.negf %130 : vector<8x64xf32>
    %132 = math.exp %131 : vector<8x64xf32>
    %cst_39 = arith.constant 1.000000e+00 : f32
    %133 = vector.broadcast %cst_39 : f32 to vector<8x64xf32>
    %134 = arith.addf %133, %132 : vector<8x64xf32>
    %135 = arith.divf %133, %134 : vector<8x64xf32>
    %136 = vector.extract_strided_slice %126 {offsets = [0, 64], sizes = [8, 64], strides = [1, 1]} : vector<8x192xf32> to vector<8x64xf32>
    %137 = vector.extract_strided_slice %127 {offsets = [0, 64], sizes = [8, 64], strides = [1, 1]} : vector<8x192xf32> to vector<8x64xf32>
    %138 = arith.addf %136, %137 : vector<8x64xf32>
    %139 = arith.negf %138 : vector<8x64xf32>
    %140 = math.exp %139 : vector<8x64xf32>
    %cst_40 = arith.constant 1.000000e+00 : f32
    %141 = vector.broadcast %cst_40 : f32 to vector<8x64xf32>
    %142 = arith.addf %141, %140 : vector<8x64xf32>
    %143 = arith.divf %141, %142 : vector<8x64xf32>
    %144 = vector.extract_strided_slice %126 {offsets = [0, 128], sizes = [8, 64], strides = [1, 1]} : vector<8x192xf32> to vector<8x64xf32>
    %145 = vector.extract_strided_slice %127 {offsets = [0, 128], sizes = [8, 64], strides = [1, 1]} : vector<8x192xf32> to vector<8x64xf32>
    %146 = arith.addf %145, %24 : vector<8x64xf32>
    %147 = arith.mulf %135, %146 : vector<8x64xf32>
    %148 = arith.addf %144, %147 : vector<8x64xf32>
    %149 = math.tanh %148 : vector<8x64xf32>
    %cst_41 = arith.constant 1.000000e+00 : f32
    %150 = vector.broadcast %cst_41 : f32 to vector<8x64xf32>
    %151 = arith.subf %150, %143 : vector<8x64xf32>
    %152 = arith.mulf %151, %149 : vector<8x64xf32>
    %153 = arith.mulf %143, %121 : vector<8x64xf32>
    %154 = arith.addf %152, %153 : vector<8x64xf32>
    %155 = vector.extract_strided_slice %154 {offsets = [0, 0], sizes = [8, 32], strides = [1, 1]} : vector<8x64xf32> to vector<8x32xf32>
    %c24_42 = arith.constant 24 : index
    %c0_43 = arith.constant 0 : index
    %156 = vector.load %arg16[%c24_42, %c0_43] : memref<64x64xf32, #tpu.memory_space<vmem>>, vector<8x32xf32>
    tpu.vector_store %arg16[%c24_42, %c0_43], %155 {strides = array<i32>} : memref<64x64xf32, #tpu.memory_space<vmem>>, vector<8x32xf32>,
    %157 = vector.extract_strided_slice %154 {offsets = [0, 32], sizes = [8, 32], strides = [1, 1]} : vector<8x64xf32> to vector<8x32xf32>
    %c32_44 = arith.constant 32 : index
    %c32_45 = arith.constant 32 : index
    %158 = vector.load %arg16[%c32_44, %c32_45] : memref<64x64xf32, #tpu.memory_space<vmem>>, vector<8x32xf32>
    tpu.vector_store %arg16[%c32_44, %c32_45], %157 {strides = array<i32>} : memref<64x64xf32, #tpu.memory_space<vmem>>, vector<8x32xf32>,
    %c32_46 = arith.constant 32 : index
    %c0_47 = arith.constant 0 : index
    %159 = vector.load %arg15[%c32_46, %c0_47] : memref<64x192xf32, #tpu.memory_space<vmem>>, vector<8x192xf32>
    %cst_48 = arith.constant dense<0.000000e+00> : vector<8x192xf32>
    %160 = tpu.matmul %154, %25, %cst_48 {dimension_numbers = #tpu.dot_dimension_numbers<[1], [0], [0], [1], [0, 0, 1, 1], [], []>} : vector<8x64xf32>, vector<64x192xf32>, vector<8x192xf32> -> vector<8x192xf32>
    %161 = vector.extract_strided_slice %159 {offsets = [0, 0], sizes = [8, 64], strides = [1, 1]} : vector<8x192xf32> to vector<8x64xf32>
    %162 = vector.extract_strided_slice %160 {offsets = [0, 0], sizes = [8, 64], strides = [1, 1]} : vector<8x192xf32> to vector<8x64xf32>
    %163 = arith.addf %161, %162 : vector<8x64xf32>
    %164 = arith.negf %163 : vector<8x64xf32>
    %165 = math.exp %164 : vector<8x64xf32>
    %cst_49 = arith.constant 1.000000e+00 : f32
    %166 = vector.broadcast %cst_49 : f32 to vector<8x64xf32>
    %167 = arith.addf %166, %165 : vector<8x64xf32>
    %168 = arith.divf %166, %167 : vector<8x64xf32>
    %169 = vector.extract_strided_slice %159 {offsets = [0, 64], sizes = [8, 64], strides = [1, 1]} : vector<8x192xf32> to vector<8x64xf32>
    %170 = vector.extract_strided_slice %160 {offsets = [0, 64], sizes = [8, 64], strides = [1, 1]} : vector<8x192xf32> to vector<8x64xf32>
    %171 = arith.addf %169, %170 : vector<8x64xf32>
    %172 = arith.negf %171 : vector<8x64xf32>
    %173 = math.exp %172 : vector<8x64xf32>
    %cst_50 = arith.constant 1.000000e+00 : f32
    %174 = vector.broadcast %cst_50 : f32 to vector<8x64xf32>
    %175 = arith.addf %174, %173 : vector<8x64xf32>
    %176 = arith.divf %174, %175 : vector<8x64xf32>
    %177 = vector.extract_strided_slice %159 {offsets = [0, 128], sizes = [8, 64], strides = [1, 1]} : vector<8x192xf32> to vector<8x64xf32>
    %178 = vector.extract_strided_slice %160 {offsets = [0, 128], sizes = [8, 64], strides = [1, 1]} : vector<8x192xf32> to vector<8x64xf32>
    %179 = arith.addf %178, %24 : vector<8x64xf32>
    %180 = arith.mulf %168, %179 : vector<8x64xf32>
    %181 = arith.addf %177, %180 : vector<8x64xf32>
    %182 = math.tanh %181 : vector<8x64xf32>
    %cst_51 = arith.constant 1.000000e+00 : f32
    %183 = vector.broadcast %cst_51 : f32 to vector<8x64xf32>
    %184 = arith.subf %183, %176 : vector<8x64xf32>
    %185 = arith.mulf %184, %182 : vector<8x64xf32>
    %186 = arith.mulf %176, %154 : vector<8x64xf32>
    %187 = arith.addf %185, %186 : vector<8x64xf32>
    %188 = vector.extract_strided_slice %187 {offsets = [0, 0], sizes = [8, 32], strides = [1, 1]} : vector<8x64xf32> to vector<8x32xf32>
    %c32_52 = arith.constant 32 : index
    %c0_53 = arith.constant 0 : index
    %189 = vector.load %arg16[%c32_52, %c0_53] : memref<64x64xf32, #tpu.memory_space<vmem>>, vector<8x32xf32>
    tpu.vector_store %arg16[%c32_52, %c0_53], %188 {strides = array<i32>} : memref<64x64xf32, #tpu.memory_space<vmem>>, vector<8x32xf32>,
    %190 = vector.extract_strided_slice %187 {offsets = [0, 32], sizes = [8, 32], strides = [1, 1]} : vector<8x64xf32> to vector<8x32xf32>
    %c24_54 = arith.constant 24 : index
    %c32_55 = arith.constant 32 : index
    %191 = vector.load %arg16[%c24_54, %c32_55] : memref<64x64xf32, #tpu.memory_space<vmem>>, vector<8x32xf32>
    tpu.vector_store %arg16[%c24_54, %c32_55], %190 {strides = array<i32>} : memref<64x64xf32, #tpu.memory_space<vmem>>, vector<8x32xf32>,
    %c40_56 = arith.constant 40 : index
    %c0_57 = arith.constant 0 : index
    %192 = vector.load %arg15[%c40_56, %c0_57] : memref<64x192xf32, #tpu.memory_space<vmem>>, vector<8x192xf32>
    %cst_58 = arith.constant dense<0.000000e+00> : vector<8x192xf32>
    %193 = tpu.matmul %187, %25, %cst_58 {dimension_numbers = #tpu.dot_dimension_numbers<[1], [0], [0], [1], [0, 0, 1, 1], [], []>} : vector<8x64xf32>, vector<64x192xf32>, vector<8x192xf32> -> vector<8x192xf32>
    %194 = vector.extract_strided_slice %192 {offsets = [0, 0], sizes = [8, 64], strides = [1, 1]} : vector<8x192xf32> to vector<8x64xf32>
    %195 = vector.extract_strided_slice %193 {offsets = [0, 0], sizes = [8, 64], strides = [1, 1]} : vector<8x192xf32> to vector<8x64xf32>
    %196 = arith.addf %194, %195 : vector<8x64xf32>
    %197 = arith.negf %196 : vector<8x64xf32>
    %198 = math.exp %197 : vector<8x64xf32>
    %cst_59 = arith.constant 1.000000e+00 : f32
    %199 = vector.broadcast %cst_59 : f32 to vector<8x64xf32>
    %200 = arith.addf %199, %198 : vector<8x64xf32>
    %201 = arith.divf %199, %200 : vector<8x64xf32>
    %202 = vector.extract_strided_slice %192 {offsets = [0, 64], sizes = [8, 64], strides = [1, 1]} : vector<8x192xf32> to vector<8x64xf32>
    %203 = vector.extract_strided_slice %193 {offsets = [0, 64], sizes = [8, 64], strides = [1, 1]} : vector<8x192xf32> to vector<8x64xf32>
    %204 = arith.addf %202, %203 : vector<8x64xf32>
    %205 = arith.negf %204 : vector<8x64xf32>
    %206 = math.exp %205 : vector<8x64xf32>
    %cst_60 = arith.constant 1.000000e+00 : f32
    %207 = vector.broadcast %cst_60 : f32 to vector<8x64xf32>
    %208 = arith.addf %207, %206 : vector<8x64xf32>
    %209 = arith.divf %207, %208 : vector<8x64xf32>
    %210 = vector.extract_strided_slice %192 {offsets = [0, 128], sizes = [8, 64], strides = [1, 1]} : vector<8x192xf32> to vector<8x64xf32>
    %211 = vector.extract_strided_slice %193 {offsets = [0, 128], sizes = [8, 64], strides = [1, 1]} : vector<8x192xf32> to vector<8x64xf32>
    %212 = arith.addf %211, %24 : vector<8x64xf32>
    %213 = arith.mulf %201, %212 : vector<8x64xf32>
    %214 = arith.addf %210, %213 : vector<8x64xf32>
    %215 = math.tanh %214 : vector<8x64xf32>
    %cst_61 = arith.constant 1.000000e+00 : f32
    %216 = vector.broadcast %cst_61 : f32 to vector<8x64xf32>
    %217 = arith.subf %216, %209 : vector<8x64xf32>
    %218 = arith.mulf %217, %215 : vector<8x64xf32>
    %219 = arith.mulf %209, %187 : vector<8x64xf32>
    %220 = arith.addf %218, %219 : vector<8x64xf32>
    %221 = vector.extract_strided_slice %220 {offsets = [0, 0], sizes = [8, 32], strides = [1, 1]} : vector<8x64xf32> to vector<8x32xf32>
    %c40_62 = arith.constant 40 : index
    %c0_63 = arith.constant 0 : index
    %222 = vector.load %arg16[%c40_62, %c0_63] : memref<64x64xf32, #tpu.memory_space<vmem>>, vector<8x32xf32>
    tpu.vector_store %arg16[%c40_62, %c0_63], %221 {strides = array<i32>} : memref<64x64xf32, #tpu.memory_space<vmem>>, vector<8x32xf32>,
    %223 = vector.extract_strided_slice %220 {offsets = [0, 32], sizes = [8, 32], strides = [1, 1]} : vector<8x64xf32> to vector<8x32xf32>
    %c16_64 = arith.constant 16 : index
    %c32_65 = arith.constant 32 : index
    %224 = vector.load %arg16[%c16_64, %c32_65] : memref<64x64xf32, #tpu.memory_space<vmem>>, vector<8x32xf32>
    tpu.vector_store %arg16[%c16_64, %c32_65], %223 {strides = array<i32>} : memref<64x64xf32, #tpu.memory_space<vmem>>, vector<8x32xf32>,
    %c48_66 = arith.constant 48 : index
    %c0_67 = arith.constant 0 : index
    %225 = vector.load %arg15[%c48_66, %c0_67] : memref<64x192xf32, #tpu.memory_space<vmem>>, vector<8x192xf32>
    %cst_68 = arith.constant dense<0.000000e+00> : vector<8x192xf32>
    %226 = tpu.matmul %220, %25, %cst_68 {dimension_numbers = #tpu.dot_dimension_numbers<[1], [0], [0], [1], [0, 0, 1, 1], [], []>} : vector<8x64xf32>, vector<64x192xf32>, vector<8x192xf32> -> vector<8x192xf32>
    %227 = vector.extract_strided_slice %225 {offsets = [0, 0], sizes = [8, 64], strides = [1, 1]} : vector<8x192xf32> to vector<8x64xf32>
    %228 = vector.extract_strided_slice %226 {offsets = [0, 0], sizes = [8, 64], strides = [1, 1]} : vector<8x192xf32> to vector<8x64xf32>
    %229 = arith.addf %227, %228 : vector<8x64xf32>
    %230 = arith.negf %229 : vector<8x64xf32>
    %231 = math.exp %230 : vector<8x64xf32>
    %cst_69 = arith.constant 1.000000e+00 : f32
    %232 = vector.broadcast %cst_69 : f32 to vector<8x64xf32>
    %233 = arith.addf %232, %231 : vector<8x64xf32>
    %234 = arith.divf %232, %233 : vector<8x64xf32>
    %235 = vector.extract_strided_slice %225 {offsets = [0, 64], sizes = [8, 64], strides = [1, 1]} : vector<8x192xf32> to vector<8x64xf32>
    %236 = vector.extract_strided_slice %226 {offsets = [0, 64], sizes = [8, 64], strides = [1, 1]} : vector<8x192xf32> to vector<8x64xf32>
    %237 = arith.addf %235, %236 : vector<8x64xf32>
    %238 = arith.negf %237 : vector<8x64xf32>
    %239 = math.exp %238 : vector<8x64xf32>
    %cst_70 = arith.constant 1.000000e+00 : f32
    %240 = vector.broadcast %cst_70 : f32 to vector<8x64xf32>
    %241 = arith.addf %240, %239 : vector<8x64xf32>
    %242 = arith.divf %240, %241 : vector<8x64xf32>
    %243 = vector.extract_strided_slice %225 {offsets = [0, 128], sizes = [8, 64], strides = [1, 1]} : vector<8x192xf32> to vector<8x64xf32>
    %244 = vector.extract_strided_slice %226 {offsets = [0, 128], sizes = [8, 64], strides = [1, 1]} : vector<8x192xf32> to vector<8x64xf32>
    %245 = arith.addf %244, %24 : vector<8x64xf32>
    %246 = arith.mulf %234, %245 : vector<8x64xf32>
    %247 = arith.addf %243, %246 : vector<8x64xf32>
    %248 = math.tanh %247 : vector<8x64xf32>
    %cst_71 = arith.constant 1.000000e+00 : f32
    %249 = vector.broadcast %cst_71 : f32 to vector<8x64xf32>
    %250 = arith.subf %249, %242 : vector<8x64xf32>
    %251 = arith.mulf %250, %248 : vector<8x64xf32>
    %252 = arith.mulf %242, %220 : vector<8x64xf32>
    %253 = arith.addf %251, %252 : vector<8x64xf32>
    %254 = vector.extract_strided_slice %253 {offsets = [0, 0], sizes = [8, 32], strides = [1, 1]} : vector<8x64xf32> to vector<8x32xf32>
    %c48_72 = arith.constant 48 : index
    %c0_73 = arith.constant 0 : index
    %255 = vector.load %arg16[%c48_72, %c0_73] : memref<64x64xf32, #tpu.memory_space<vmem>>, vector<8x32xf32>
    tpu.vector_store %arg16[%c48_72, %c0_73], %254 {strides = array<i32>} : memref<64x64xf32, #tpu.memory_space<vmem>>, vector<8x32xf32>,
    %256 = vector.extract_strided_slice %253 {offsets = [0, 32], sizes = [8, 32], strides = [1, 1]} : vector<8x64xf32> to vector<8x32xf32>
    %c8_74 = arith.constant 8 : index
    %c32_75 = arith.constant 32 : index
    %257 = vector.load %arg16[%c8_74, %c32_75] : memref<64x64xf32, #tpu.memory_space<vmem>>, vector<8x32xf32>
    tpu.vector_store %arg16[%c8_74, %c32_75], %256 {strides = array<i32>} : memref<64x64xf32, #tpu.memory_space<vmem>>, vector<8x32xf32>,
    %c56_76 = arith.constant 56 : index
    %c0_77 = arith.constant 0 : index
    %258 = vector.load %arg15[%c56_76, %c0_77] : memref<64x192xf32, #tpu.memory_space<vmem>>, vector<8x192xf32>
    %cst_78 = arith.constant dense<0.000000e+00> : vector<8x192xf32>
    %259 = tpu.matmul %253, %25, %cst_78 {dimension_numbers = #tpu.dot_dimension_numbers<[1], [0], [0], [1], [0, 0, 1, 1], [], []>} : vector<8x64xf32>, vector<64x192xf32>, vector<8x192xf32> -> vector<8x192xf32>
    %260 = vector.extract_strided_slice %258 {offsets = [0, 0], sizes = [8, 64], strides = [1, 1]} : vector<8x192xf32> to vector<8x64xf32>
    %261 = vector.extract_strided_slice %259 {offsets = [0, 0], sizes = [8, 64], strides = [1, 1]} : vector<8x192xf32> to vector<8x64xf32>
    %262 = arith.addf %260, %261 : vector<8x64xf32>
    %263 = arith.negf %262 : vector<8x64xf32>
    %264 = math.exp %263 : vector<8x64xf32>
    %cst_79 = arith.constant 1.000000e+00 : f32
    %265 = vector.broadcast %cst_79 : f32 to vector<8x64xf32>
    %266 = arith.addf %265, %264 : vector<8x64xf32>
    %267 = arith.divf %265, %266 : vector<8x64xf32>
    %268 = vector.extract_strided_slice %258 {offsets = [0, 64], sizes = [8, 64], strides = [1, 1]} : vector<8x192xf32> to vector<8x64xf32>
    %269 = vector.extract_strided_slice %259 {offsets = [0, 64], sizes = [8, 64], strides = [1, 1]} : vector<8x192xf32> to vector<8x64xf32>
    %270 = arith.addf %268, %269 : vector<8x64xf32>
    %271 = arith.negf %270 : vector<8x64xf32>
    %272 = math.exp %271 : vector<8x64xf32>
    %cst_80 = arith.constant 1.000000e+00 : f32
    %273 = vector.broadcast %cst_80 : f32 to vector<8x64xf32>
    %274 = arith.addf %273, %272 : vector<8x64xf32>
    %275 = arith.divf %273, %274 : vector<8x64xf32>
    %276 = vector.extract_strided_slice %258 {offsets = [0, 128], sizes = [8, 64], strides = [1, 1]} : vector<8x192xf32> to vector<8x64xf32>
    %277 = vector.extract_strided_slice %259 {offsets = [0, 128], sizes = [8, 64], strides = [1, 1]} : vector<8x192xf32> to vector<8x64xf32>
    %278 = arith.addf %277, %24 : vector<8x64xf32>
    %279 = arith.mulf %267, %278 : vector<8x64xf32>
    %280 = arith.addf %276, %279 : vector<8x64xf32>
    %281 = math.tanh %280 : vector<8x64xf32>
    %cst_81 = arith.constant 1.000000e+00 : f32
    %282 = vector.broadcast %cst_81 : f32 to vector<8x64xf32>
    %283 = arith.subf %282, %275 : vector<8x64xf32>
    %284 = arith.mulf %283, %281 : vector<8x64xf32>
    %285 = arith.mulf %275, %253 : vector<8x64xf32>
    %286 = arith.addf %284, %285 : vector<8x64xf32>
    %287 = vector.extract_strided_slice %286 {offsets = [0, 0], sizes = [8, 32], strides = [1, 1]} : vector<8x64xf32> to vector<8x32xf32>
    %c56_82 = arith.constant 56 : index
    %c0_83 = arith.constant 0 : index
    %288 = vector.load %arg16[%c56_82, %c0_83] : memref<64x64xf32, #tpu.memory_space<vmem>>, vector<8x32xf32>
    tpu.vector_store %arg16[%c56_82, %c0_83], %287 {strides = array<i32>} : memref<64x64xf32, #tpu.memory_space<vmem>>, vector<8x32xf32>,
    %289 = vector.extract_strided_slice %286 {offsets = [0, 32], sizes = [8, 32], strides = [1, 1]} : vector<8x64xf32> to vector<8x32xf32>
    %c0_84 = arith.constant 0 : index
    %c32_85 = arith.constant 32 : index
    %290 = vector.load %arg16[%c0_84, %c32_85] : memref<64x64xf32, #tpu.memory_space<vmem>>, vector<8x32xf32>
    tpu.vector_store %arg16[%c0_84, %c32_85], %289 {strides = array<i32>} : memref<64x64xf32, #tpu.memory_space<vmem>>, vector<8x32xf32>,
    %c0_86 = arith.constant 0 : index
    %c0_87 = arith.constant 0 : index
    %291 = vector.load %arg16[%c0_86, %c0_87] : memref<64x64xf32, #tpu.memory_space<vmem>>, vector<64x64xf32>
    %c0_88 = arith.constant 0 : index
    %c0_89 = arith.constant 0 : index
    %292 = vector.load %arg5[%c0_88, %c0_89] : memref<64x96xf32, #tpu.memory_space<vmem>>, vector<64x96xf32>
    %cst_90 = arith.constant dense<0.000000e+00> : vector<64x96xf32>
    %293 = tpu.matmul %291, %292, %cst_90 {dimension_numbers = #tpu.dot_dimension_numbers<[1], [0], [0], [1], [0, 0, 1, 1], [], []>} : vector<64x64xf32>, vector<64x96xf32>, vector<64x96xf32> -> vector<64x96xf32>
    %c0_91 = arith.constant 0 : index
    %c0_92 = arith.constant 0 : index
    %294 = vector.load %arg6[%c0_91, %c0_92] : memref<1x96xf32, #tpu.memory_space<vmem>>, vector<1x96xf32>
    %295 = vector.broadcast %294 : vector<1x96xf32> to vector<64x96xf32>
    %296 = arith.addf %293, %295 : vector<64x96xf32>
    %c0_93 = arith.constant 0 : index
    %c0_94 = arith.constant 0 : index
    %297 = vector.load %arg17[%c0_93, %c0_94] : memref<64x96xf32, #tpu.memory_space<vmem>>, vector<64x96xf32>
    tpu.vector_store %arg17[%c0_93, %c0_94], %296 {strides = array<i32>} : memref<64x96xf32, #tpu.memory_space<vmem>>, vector<64x96xf32>,
    %c0_95 = arith.constant 0 : index
    %c0_96 = arith.constant 0 : index
    %298 = vector.load %arg8[%c0_95, %c0_96] : memref<1x32xf32, #tpu.memory_space<vmem>>, vector<1x32xf32>
    %299 = vector.shape_cast %298 : vector<1x32xf32> to vector<1x32xf32>
    %300 = vector.broadcast %299 : vector<1x32xf32> to vector<8x32xf32>
    %c0_97 = arith.constant 0 : index
    %c0_98 = arith.constant 0 : index
    %301 = vector.load %arg7[%c0_97, %c0_98] : memref<32x96xf32, #tpu.memory_space<vmem>>, vector<32x96xf32>
    %cst_99 = arith.constant 0.000000e+00 : f32
    %302 = vector.broadcast %cst_99 : f32 to vector<8x32xf32>
    %c0_100 = arith.constant 0 : index
    %c0_101 = arith.constant 0 : index
    %303 = vector.load %arg17[%c0_100, %c0_101] : memref<64x96xf32, #tpu.memory_space<vmem>>, vector<8x96xf32>
    %cst_102 = arith.constant dense<0.000000e+00> : vector<8x96xf32>
    %304 = tpu.matmul %302, %301, %cst_102 {dimension_numbers = #tpu.dot_dimension_numbers<[1], [0], [0], [1], [0, 0, 1, 1], [], []>} : vector<8x32xf32>, vector<32x96xf32>, vector<8x96xf32> -> vector<8x96xf32>
    %305 = vector.extract_strided_slice %303 {offsets = [0, 0], sizes = [8, 32], strides = [1, 1]} : vector<8x96xf32> to vector<8x32xf32>
    %306 = vector.extract_strided_slice %304 {offsets = [0, 0], sizes = [8, 32], strides = [1, 1]} : vector<8x96xf32> to vector<8x32xf32>
    %307 = arith.addf %305, %306 : vector<8x32xf32>
    %308 = arith.negf %307 : vector<8x32xf32>
    %309 = math.exp %308 : vector<8x32xf32>
    %cst_103 = arith.constant 1.000000e+00 : f32
    %310 = vector.broadcast %cst_103 : f32 to vector<8x32xf32>
    %311 = arith.addf %310, %309 : vector<8x32xf32>
    %312 = arith.divf %310, %311 : vector<8x32xf32>
    %313 = vector.extract_strided_slice %303 {offsets = [0, 32], sizes = [8, 32], strides = [1, 1]} : vector<8x96xf32> to vector<8x32xf32>
    %314 = vector.extract_strided_slice %304 {offsets = [0, 32], sizes = [8, 32], strides = [1, 1]} : vector<8x96xf32> to vector<8x32xf32>
    %315 = arith.addf %313, %314 : vector<8x32xf32>
    %316 = arith.negf %315 : vector<8x32xf32>
    %317 = math.exp %316 : vector<8x32xf32>
    %cst_104 = arith.constant 1.000000e+00 : f32
    %318 = vector.broadcast %cst_104 : f32 to vector<8x32xf32>
    %319 = arith.addf %318, %317 : vector<8x32xf32>
    %320 = arith.divf %318, %319 : vector<8x32xf32>
    %321 = vector.extract_strided_slice %303 {offsets = [0, 64], sizes = [8, 32], strides = [1, 1]} : vector<8x96xf32> to vector<8x32xf32>
    %322 = vector.extract_strided_slice %304 {offsets = [0, 64], sizes = [8, 32], strides = [1, 1]} : vector<8x96xf32> to vector<8x32xf32>
    %323 = arith.addf %322, %300 : vector<8x32xf32>
    %324 = arith.mulf %312, %323 : vector<8x32xf32>
    %325 = arith.addf %321, %324 : vector<8x32xf32>
    %326 = math.tanh %325 : vector<8x32xf32>
    %cst_105 = arith.constant 1.000000e+00 : f32
    %327 = vector.broadcast %cst_105 : f32 to vector<8x32xf32>
    %328 = arith.subf %327, %320 : vector<8x32xf32>
    %329 = arith.mulf %328, %326 : vector<8x32xf32>
    %330 = arith.mulf %320, %302 : vector<8x32xf32>
    %331 = arith.addf %329, %330 : vector<8x32xf32>
    %c8_106 = arith.constant 8 : index
    %c0_107 = arith.constant 0 : index
    %332 = vector.load %arg17[%c8_106, %c0_107] : memref<64x96xf32, #tpu.memory_space<vmem>>, vector<8x96xf32>
    %cst_108 = arith.constant dense<0.000000e+00> : vector<8x96xf32>
    %333 = tpu.matmul %331, %301, %cst_108 {dimension_numbers = #tpu.dot_dimension_numbers<[1], [0], [0], [1], [0, 0, 1, 1], [], []>} : vector<8x32xf32>, vector<32x96xf32>, vector<8x96xf32> -> vector<8x96xf32>
    %334 = vector.extract_strided_slice %332 {offsets = [0, 0], sizes = [8, 32], strides = [1, 1]} : vector<8x96xf32> to vector<8x32xf32>
    %335 = vector.extract_strided_slice %333 {offsets = [0, 0], sizes = [8, 32], strides = [1, 1]} : vector<8x96xf32> to vector<8x32xf32>
    %336 = arith.addf %334, %335 : vector<8x32xf32>
    %337 = arith.negf %336 : vector<8x32xf32>
    %338 = math.exp %337 : vector<8x32xf32>
    %cst_109 = arith.constant 1.000000e+00 : f32
    %339 = vector.broadcast %cst_109 : f32 to vector<8x32xf32>
    %340 = arith.addf %339, %338 : vector<8x32xf32>
    %341 = arith.divf %339, %340 : vector<8x32xf32>
    %342 = vector.extract_strided_slice %332 {offsets = [0, 32], sizes = [8, 32], strides = [1, 1]} : vector<8x96xf32> to vector<8x32xf32>
    %343 = vector.extract_strided_slice %333 {offsets = [0, 32], sizes = [8, 32], strides = [1, 1]} : vector<8x96xf32> to vector<8x32xf32>
    %344 = arith.addf %342, %343 : vector<8x32xf32>
    %345 = arith.negf %344 : vector<8x32xf32>
    %346 = math.exp %345 : vector<8x32xf32>
    %cst_110 = arith.constant 1.000000e+00 : f32
    %347 = vector.broadcast %cst_110 : f32 to vector<8x32xf32>
    %348 = arith.addf %347, %346 : vector<8x32xf32>
    %349 = arith.divf %347, %348 : vector<8x32xf32>
    %350 = vector.extract_strided_slice %332 {offsets = [0, 64], sizes = [8, 32], strides = [1, 1]} : vector<8x96xf32> to vector<8x32xf32>
    %351 = vector.extract_strided_slice %333 {offsets = [0, 64], sizes = [8, 32], strides = [1, 1]} : vector<8x96xf32> to vector<8x32xf32>
    %352 = arith.addf %351, %300 : vector<8x32xf32>
    %353 = arith.mulf %341, %352 : vector<8x32xf32>
    %354 = arith.addf %350, %353 : vector<8x32xf32>
    %355 = math.tanh %354 : vector<8x32xf32>
    %cst_111 = arith.constant 1.000000e+00 : f32
    %356 = vector.broadcast %cst_111 : f32 to vector<8x32xf32>
    %357 = arith.subf %356, %349 : vector<8x32xf32>
    %358 = arith.mulf %357, %355 : vector<8x32xf32>
    %359 = arith.mulf %349, %331 : vector<8x32xf32>
    %360 = arith.addf %358, %359 : vector<8x32xf32>
    %c16_112 = arith.constant 16 : index
    %c0_113 = arith.constant 0 : index
    %361 = vector.load %arg17[%c16_112, %c0_113] : memref<64x96xf32, #tpu.memory_space<vmem>>, vector<8x96xf32>
    %cst_114 = arith.constant dense<0.000000e+00> : vector<8x96xf32>
    %362 = tpu.matmul %360, %301, %cst_114 {dimension_numbers = #tpu.dot_dimension_numbers<[1], [0], [0], [1], [0, 0, 1, 1], [], []>} : vector<8x32xf32>, vector<32x96xf32>, vector<8x96xf32> -> vector<8x96xf32>
    %363 = vector.extract_strided_slice %361 {offsets = [0, 0], sizes = [8, 32], strides = [1, 1]} : vector<8x96xf32> to vector<8x32xf32>
    %364 = vector.extract_strided_slice %362 {offsets = [0, 0], sizes = [8, 32], strides = [1, 1]} : vector<8x96xf32> to vector<8x32xf32>
    %365 = arith.addf %363, %364 : vector<8x32xf32>
    %366 = arith.negf %365 : vector<8x32xf32>
    %367 = math.exp %366 : vector<8x32xf32>
    %cst_115 = arith.constant 1.000000e+00 : f32
    %368 = vector.broadcast %cst_115 : f32 to vector<8x32xf32>
    %369 = arith.addf %368, %367 : vector<8x32xf32>
    %370 = arith.divf %368, %369 : vector<8x32xf32>
    %371 = vector.extract_strided_slice %361 {offsets = [0, 32], sizes = [8, 32], strides = [1, 1]} : vector<8x96xf32> to vector<8x32xf32>
    %372 = vector.extract_strided_slice %362 {offsets = [0, 32], sizes = [8, 32], strides = [1, 1]} : vector<8x96xf32> to vector<8x32xf32>
    %373 = arith.addf %371, %372 : vector<8x32xf32>
    %374 = arith.negf %373 : vector<8x32xf32>
    %375 = math.exp %374 : vector<8x32xf32>
    %cst_116 = arith.constant 1.000000e+00 : f32
    %376 = vector.broadcast %cst_116 : f32 to vector<8x32xf32>
    %377 = arith.addf %376, %375 : vector<8x32xf32>
    %378 = arith.divf %376, %377 : vector<8x32xf32>
    %379 = vector.extract_strided_slice %361 {offsets = [0, 64], sizes = [8, 32], strides = [1, 1]} : vector<8x96xf32> to vector<8x32xf32>
    %380 = vector.extract_strided_slice %362 {offsets = [0, 64], sizes = [8, 32], strides = [1, 1]} : vector<8x96xf32> to vector<8x32xf32>
    %381 = arith.addf %380, %300 : vector<8x32xf32>
    %382 = arith.mulf %370, %381 : vector<8x32xf32>
    %383 = arith.addf %379, %382 : vector<8x32xf32>
    %384 = math.tanh %383 : vector<8x32xf32>
    %cst_117 = arith.constant 1.000000e+00 : f32
    %385 = vector.broadcast %cst_117 : f32 to vector<8x32xf32>
    %386 = arith.subf %385, %378 : vector<8x32xf32>
    %387 = arith.mulf %386, %384 : vector<8x32xf32>
    %388 = arith.mulf %378, %360 : vector<8x32xf32>
    %389 = arith.addf %387, %388 : vector<8x32xf32>
    %c24_118 = arith.constant 24 : index
    %c0_119 = arith.constant 0 : index
    %390 = vector.load %arg17[%c24_118, %c0_119] : memref<64x96xf32, #tpu.memory_space<vmem>>, vector<8x96xf32>
    %cst_120 = arith.constant dense<0.000000e+00> : vector<8x96xf32>
    %391 = tpu.matmul %389, %301, %cst_120 {dimension_numbers = #tpu.dot_dimension_numbers<[1], [0], [0], [1], [0, 0, 1, 1], [], []>} : vector<8x32xf32>, vector<32x96xf32>, vector<8x96xf32> -> vector<8x96xf32>
    %392 = vector.extract_strided_slice %390 {offsets = [0, 0], sizes = [8, 32], strides = [1, 1]} : vector<8x96xf32> to vector<8x32xf32>
    %393 = vector.extract_strided_slice %391 {offsets = [0, 0], sizes = [8, 32], strides = [1, 1]} : vector<8x96xf32> to vector<8x32xf32>
    %394 = arith.addf %392, %393 : vector<8x32xf32>
    %395 = arith.negf %394 : vector<8x32xf32>
    %396 = math.exp %395 : vector<8x32xf32>
    %cst_121 = arith.constant 1.000000e+00 : f32
    %397 = vector.broadcast %cst_121 : f32 to vector<8x32xf32>
    %398 = arith.addf %397, %396 : vector<8x32xf32>
    %399 = arith.divf %397, %398 : vector<8x32xf32>
    %400 = vector.extract_strided_slice %390 {offsets = [0, 32], sizes = [8, 32], strides = [1, 1]} : vector<8x96xf32> to vector<8x32xf32>
    %401 = vector.extract_strided_slice %391 {offsets = [0, 32], sizes = [8, 32], strides = [1, 1]} : vector<8x96xf32> to vector<8x32xf32>
    %402 = arith.addf %400, %401 : vector<8x32xf32>
    %403 = arith.negf %402 : vector<8x32xf32>
    %404 = math.exp %403 : vector<8x32xf32>
    %cst_122 = arith.constant 1.000000e+00 : f32
    %405 = vector.broadcast %cst_122 : f32 to vector<8x32xf32>
    %406 = arith.addf %405, %404 : vector<8x32xf32>
    %407 = arith.divf %405, %406 : vector<8x32xf32>
    %408 = vector.extract_strided_slice %390 {offsets = [0, 64], sizes = [8, 32], strides = [1, 1]} : vector<8x96xf32> to vector<8x32xf32>
    %409 = vector.extract_strided_slice %391 {offsets = [0, 64], sizes = [8, 32], strides = [1, 1]} : vector<8x96xf32> to vector<8x32xf32>
    %410 = arith.addf %409, %300 : vector<8x32xf32>
    %411 = arith.mulf %399, %410 : vector<8x32xf32>
    %412 = arith.addf %408, %411 : vector<8x32xf32>
    %413 = math.tanh %412 : vector<8x32xf32>
    %cst_123 = arith.constant 1.000000e+00 : f32
    %414 = vector.broadcast %cst_123 : f32 to vector<8x32xf32>
    %415 = arith.subf %414, %407 : vector<8x32xf32>
    %416 = arith.mulf %415, %413 : vector<8x32xf32>
    %417 = arith.mulf %407, %389 : vector<8x32xf32>
    %418 = arith.addf %416, %417 : vector<8x32xf32>
    %c32_124 = arith.constant 32 : index
    %c0_125 = arith.constant 0 : index
    %419 = vector.load %arg17[%c32_124, %c0_125] : memref<64x96xf32, #tpu.memory_space<vmem>>, vector<8x96xf32>
    %cst_126 = arith.constant dense<0.000000e+00> : vector<8x96xf32>
    %420 = tpu.matmul %418, %301, %cst_126 {dimension_numbers = #tpu.dot_dimension_numbers<[1], [0], [0], [1], [0, 0, 1, 1], [], []>} : vector<8x32xf32>, vector<32x96xf32>, vector<8x96xf32> -> vector<8x96xf32>
    %421 = vector.extract_strided_slice %419 {offsets = [0, 0], sizes = [8, 32], strides = [1, 1]} : vector<8x96xf32> to vector<8x32xf32>
    %422 = vector.extract_strided_slice %420 {offsets = [0, 0], sizes = [8, 32], strides = [1, 1]} : vector<8x96xf32> to vector<8x32xf32>
    %423 = arith.addf %421, %422 : vector<8x32xf32>
    %424 = arith.negf %423 : vector<8x32xf32>
    %425 = math.exp %424 : vector<8x32xf32>
    %cst_127 = arith.constant 1.000000e+00 : f32
    %426 = vector.broadcast %cst_127 : f32 to vector<8x32xf32>
    %427 = arith.addf %426, %425 : vector<8x32xf32>
    %428 = arith.divf %426, %427 : vector<8x32xf32>
    %429 = vector.extract_strided_slice %419 {offsets = [0, 32], sizes = [8, 32], strides = [1, 1]} : vector<8x96xf32> to vector<8x32xf32>
    %430 = vector.extract_strided_slice %420 {offsets = [0, 32], sizes = [8, 32], strides = [1, 1]} : vector<8x96xf32> to vector<8x32xf32>
    %431 = arith.addf %429, %430 : vector<8x32xf32>
    %432 = arith.negf %431 : vector<8x32xf32>
    %433 = math.exp %432 : vector<8x32xf32>
    %cst_128 = arith.constant 1.000000e+00 : f32
    %434 = vector.broadcast %cst_128 : f32 to vector<8x32xf32>
    %435 = arith.addf %434, %433 : vector<8x32xf32>
    %436 = arith.divf %434, %435 : vector<8x32xf32>
    %437 = vector.extract_strided_slice %419 {offsets = [0, 64], sizes = [8, 32], strides = [1, 1]} : vector<8x96xf32> to vector<8x32xf32>
    %438 = vector.extract_strided_slice %420 {offsets = [0, 64], sizes = [8, 32], strides = [1, 1]} : vector<8x96xf32> to vector<8x32xf32>
    %439 = arith.addf %438, %300 : vector<8x32xf32>
    %440 = arith.mulf %428, %439 : vector<8x32xf32>
    %441 = arith.addf %437, %440 : vector<8x32xf32>
    %442 = math.tanh %441 : vector<8x32xf32>
    %cst_129 = arith.constant 1.000000e+00 : f32
    %443 = vector.broadcast %cst_129 : f32 to vector<8x32xf32>
    %444 = arith.subf %443, %436 : vector<8x32xf32>
    %445 = arith.mulf %444, %442 : vector<8x32xf32>
    %446 = arith.mulf %436, %418 : vector<8x32xf32>
    %447 = arith.addf %445, %446 : vector<8x32xf32>
    %c40_130 = arith.constant 40 : index
    %c0_131 = arith.constant 0 : index
    %448 = vector.load %arg17[%c40_130, %c0_131] : memref<64x96xf32, #tpu.memory_space<vmem>>, vector<8x96xf32>
    %cst_132 = arith.constant dense<0.000000e+00> : vector<8x96xf32>
    %449 = tpu.matmul %447, %301, %cst_132 {dimension_numbers = #tpu.dot_dimension_numbers<[1], [0], [0], [1], [0, 0, 1, 1], [], []>} : vector<8x32xf32>, vector<32x96xf32>, vector<8x96xf32> -> vector<8x96xf32>
    %450 = vector.extract_strided_slice %448 {offsets = [0, 0], sizes = [8, 32], strides = [1, 1]} : vector<8x96xf32> to vector<8x32xf32>
    %451 = vector.extract_strided_slice %449 {offsets = [0, 0], sizes = [8, 32], strides = [1, 1]} : vector<8x96xf32> to vector<8x32xf32>
    %452 = arith.addf %450, %451 : vector<8x32xf32>
    %453 = arith.negf %452 : vector<8x32xf32>
    %454 = math.exp %453 : vector<8x32xf32>
    %cst_133 = arith.constant 1.000000e+00 : f32
    %455 = vector.broadcast %cst_133 : f32 to vector<8x32xf32>
    %456 = arith.addf %455, %454 : vector<8x32xf32>
    %457 = arith.divf %455, %456 : vector<8x32xf32>
    %458 = vector.extract_strided_slice %448 {offsets = [0, 32], sizes = [8, 32], strides = [1, 1]} : vector<8x96xf32> to vector<8x32xf32>
    %459 = vector.extract_strided_slice %449 {offsets = [0, 32], sizes = [8, 32], strides = [1, 1]} : vector<8x96xf32> to vector<8x32xf32>
    %460 = arith.addf %458, %459 : vector<8x32xf32>
    %461 = arith.negf %460 : vector<8x32xf32>
    %462 = math.exp %461 : vector<8x32xf32>
    %cst_134 = arith.constant 1.000000e+00 : f32
    %463 = vector.broadcast %cst_134 : f32 to vector<8x32xf32>
    %464 = arith.addf %463, %462 : vector<8x32xf32>
    %465 = arith.divf %463, %464 : vector<8x32xf32>
    %466 = vector.extract_strided_slice %448 {offsets = [0, 64], sizes = [8, 32], strides = [1, 1]} : vector<8x96xf32> to vector<8x32xf32>
    %467 = vector.extract_strided_slice %449 {offsets = [0, 64], sizes = [8, 32], strides = [1, 1]} : vector<8x96xf32> to vector<8x32xf32>
    %468 = arith.addf %467, %300 : vector<8x32xf32>
    %469 = arith.mulf %457, %468 : vector<8x32xf32>
    %470 = arith.addf %466, %469 : vector<8x32xf32>
    %471 = math.tanh %470 : vector<8x32xf32>
    %cst_135 = arith.constant 1.000000e+00 : f32
    %472 = vector.broadcast %cst_135 : f32 to vector<8x32xf32>
    %473 = arith.subf %472, %465 : vector<8x32xf32>
    %474 = arith.mulf %473, %471 : vector<8x32xf32>
    %475 = arith.mulf %465, %447 : vector<8x32xf32>
    %476 = arith.addf %474, %475 : vector<8x32xf32>
    %c48_136 = arith.constant 48 : index
    %c0_137 = arith.constant 0 : index
    %477 = vector.load %arg17[%c48_136, %c0_137] : memref<64x96xf32, #tpu.memory_space<vmem>>, vector<8x96xf32>
    %cst_138 = arith.constant dense<0.000000e+00> : vector<8x96xf32>
    %478 = tpu.matmul %476, %301, %cst_138 {dimension_numbers = #tpu.dot_dimension_numbers<[1], [0], [0], [1], [0, 0, 1, 1], [], []>} : vector<8x32xf32>, vector<32x96xf32>, vector<8x96xf32> -> vector<8x96xf32>
    %479 = vector.extract_strided_slice %477 {offsets = [0, 0], sizes = [8, 32], strides = [1, 1]} : vector<8x96xf32> to vector<8x32xf32>
    %480 = vector.extract_strided_slice %478 {offsets = [0, 0], sizes = [8, 32], strides = [1, 1]} : vector<8x96xf32> to vector<8x32xf32>
    %481 = arith.addf %479, %480 : vector<8x32xf32>
    %482 = arith.negf %481 : vector<8x32xf32>
    %483 = math.exp %482 : vector<8x32xf32>
    %cst_139 = arith.constant 1.000000e+00 : f32
    %484 = vector.broadcast %cst_139 : f32 to vector<8x32xf32>
    %485 = arith.addf %484, %483 : vector<8x32xf32>
    %486 = arith.divf %484, %485 : vector<8x32xf32>
    %487 = vector.extract_strided_slice %477 {offsets = [0, 32], sizes = [8, 32], strides = [1, 1]} : vector<8x96xf32> to vector<8x32xf32>
    %488 = vector.extract_strided_slice %478 {offsets = [0, 32], sizes = [8, 32], strides = [1, 1]} : vector<8x96xf32> to vector<8x32xf32>
    %489 = arith.addf %487, %488 : vector<8x32xf32>
    %490 = arith.negf %489 : vector<8x32xf32>
    %491 = math.exp %490 : vector<8x32xf32>
    %cst_140 = arith.constant 1.000000e+00 : f32
    %492 = vector.broadcast %cst_140 : f32 to vector<8x32xf32>
    %493 = arith.addf %492, %491 : vector<8x32xf32>
    %494 = arith.divf %492, %493 : vector<8x32xf32>
    %495 = vector.extract_strided_slice %477 {offsets = [0, 64], sizes = [8, 32], strides = [1, 1]} : vector<8x96xf32> to vector<8x32xf32>
    %496 = vector.extract_strided_slice %478 {offsets = [0, 64], sizes = [8, 32], strides = [1, 1]} : vector<8x96xf32> to vector<8x32xf32>
    %497 = arith.addf %496, %300 : vector<8x32xf32>
    %498 = arith.mulf %486, %497 : vector<8x32xf32>
    %499 = arith.addf %495, %498 : vector<8x32xf32>
    %500 = math.tanh %499 : vector<8x32xf32>
    %cst_141 = arith.constant 1.000000e+00 : f32
    %501 = vector.broadcast %cst_141 : f32 to vector<8x32xf32>
    %502 = arith.subf %501, %494 : vector<8x32xf32>
    %503 = arith.mulf %502, %500 : vector<8x32xf32>
    %504 = arith.mulf %494, %476 : vector<8x32xf32>
    %505 = arith.addf %503, %504 : vector<8x32xf32>
    %c56_142 = arith.constant 56 : index
    %c0_143 = arith.constant 0 : index
    %506 = vector.load %arg17[%c56_142, %c0_143] : memref<64x96xf32, #tpu.memory_space<vmem>>, vector<8x96xf32>
    %cst_144 = arith.constant dense<0.000000e+00> : vector<8x96xf32>
    %507 = tpu.matmul %505, %301, %cst_144 {dimension_numbers = #tpu.dot_dimension_numbers<[1], [0], [0], [1], [0, 0, 1, 1], [], []>} : vector<8x32xf32>, vector<32x96xf32>, vector<8x96xf32> -> vector<8x96xf32>
    %508 = vector.extract_strided_slice %506 {offsets = [0, 0], sizes = [8, 32], strides = [1, 1]} : vector<8x96xf32> to vector<8x32xf32>
    %509 = vector.extract_strided_slice %507 {offsets = [0, 0], sizes = [8, 32], strides = [1, 1]} : vector<8x96xf32> to vector<8x32xf32>
    %510 = arith.addf %508, %509 : vector<8x32xf32>
    %511 = arith.negf %510 : vector<8x32xf32>
    %512 = math.exp %511 : vector<8x32xf32>
    %cst_145 = arith.constant 1.000000e+00 : f32
    %513 = vector.broadcast %cst_145 : f32 to vector<8x32xf32>
    %514 = arith.addf %513, %512 : vector<8x32xf32>
    %515 = arith.divf %513, %514 : vector<8x32xf32>
    %516 = vector.extract_strided_slice %506 {offsets = [0, 32], sizes = [8, 32], strides = [1, 1]} : vector<8x96xf32> to vector<8x32xf32>
    %517 = vector.extract_strided_slice %507 {offsets = [0, 32], sizes = [8, 32], strides = [1, 1]} : vector<8x96xf32> to vector<8x32xf32>
    %518 = arith.addf %516, %517 : vector<8x32xf32>
    %519 = arith.negf %518 : vector<8x32xf32>
    %520 = math.exp %519 : vector<8x32xf32>
    %cst_146 = arith.constant 1.000000e+00 : f32
    %521 = vector.broadcast %cst_146 : f32 to vector<8x32xf32>
    %522 = arith.addf %521, %520 : vector<8x32xf32>
    %523 = arith.divf %521, %522 : vector<8x32xf32>
    %524 = vector.extract_strided_slice %506 {offsets = [0, 64], sizes = [8, 32], strides = [1, 1]} : vector<8x96xf32> to vector<8x32xf32>
    %525 = vector.extract_strided_slice %507 {offsets = [0, 64], sizes = [8, 32], strides = [1, 1]} : vector<8x96xf32> to vector<8x32xf32>
    %526 = arith.addf %525, %300 : vector<8x32xf32>
    %527 = arith.mulf %515, %526 : vector<8x32xf32>
    %528 = arith.addf %524, %527 : vector<8x32xf32>
    %529 = math.tanh %528 : vector<8x32xf32>
    %cst_147 = arith.constant 1.000000e+00 : f32
    %530 = vector.broadcast %cst_147 : f32 to vector<8x32xf32>
    %531 = arith.subf %530, %523 : vector<8x32xf32>
    %532 = arith.mulf %531, %529 : vector<8x32xf32>
    %533 = arith.mulf %523, %505 : vector<8x32xf32>
    %534 = arith.addf %532, %533 : vector<8x32xf32>
    %c56_148 = arith.constant 56 : index
    %c0_149 = arith.constant 0 : index
    %535 = vector.load %arg16[%c56_148, %c0_149] : memref<64x64xf32, #tpu.memory_space<vmem>>, vector<8x64xf32>
    %c0_150 = arith.constant 0 : index
    %c0_151 = arith.constant 0 : index
    %536 = vector.load %arg9[%c0_150, %c0_151] : memref<64x96xf32, #tpu.memory_space<vmem>>, vector<64x96xf32>
    %cst_152 = arith.constant dense<0.000000e+00> : vector<8x96xf32>
    %537 = tpu.matmul %535, %536, %cst_152 {dimension_numbers = #tpu.dot_dimension_numbers<[1], [0], [0], [1], [0, 0, 1, 1], [], []>} : vector<8x64xf32>, vector<64x96xf32>, vector<8x96xf32> -> vector<8x96xf32>
    %c0_153 = arith.constant 0 : index
    %c0_154 = arith.constant 0 : index
    %538 = vector.load %arg10[%c0_153, %c0_154] : memref<1x96xf32, #tpu.memory_space<vmem>>, vector<1x96xf32>
    %539 = vector.broadcast %538 : vector<1x96xf32> to vector<8x96xf32>
    %540 = arith.addf %537, %539 : vector<8x96xf32>
    %541 = vector.extract_strided_slice %540 {offsets = [0, 0], sizes = [8, 32], strides = [1, 1]} : vector<8x96xf32> to vector<8x32xf32>
    %542 = arith.negf %541 : vector<8x32xf32>
    %543 = math.exp %542 : vector<8x32xf32>
    %cst_155 = arith.constant 1.000000e+00 : f32
    %544 = vector.broadcast %cst_155 : f32 to vector<8x32xf32>
    %545 = arith.addf %544, %543 : vector<8x32xf32>
    %546 = arith.divf %544, %545 : vector<8x32xf32>
    %547 = vector.extract_strided_slice %540 {offsets = [0, 32], sizes = [8, 32], strides = [1, 1]} : vector<8x96xf32> to vector<8x32xf32>
    %548 = arith.negf %547 : vector<8x32xf32>
    %549 = math.exp %548 : vector<8x32xf32>
    %cst_156 = arith.constant 1.000000e+00 : f32
    %550 = vector.broadcast %cst_156 : f32 to vector<8x32xf32>
    %551 = arith.addf %550, %549 : vector<8x32xf32>
    %552 = arith.divf %550, %551 : vector<8x32xf32>
    %553 = vector.extract_strided_slice %540 {offsets = [0, 64], sizes = [8, 32], strides = [1, 1]} : vector<8x96xf32> to vector<8x32xf32>
    %c0_157 = arith.constant 0 : index
    %c0_158 = arith.constant 0 : index
    %554 = vector.load %arg11[%c0_157, %c0_158] : memref<1x32xf32, #tpu.memory_space<vmem>>, vector<1x32xf32>
    %555 = vector.broadcast %554 : vector<1x32xf32> to vector<8x32xf32>
    %556 = arith.mulf %546, %555 : vector<8x32xf32>
    %557 = arith.addf %553, %556 : vector<8x32xf32>
    %558 = math.tanh %557 : vector<8x32xf32>
    %cst_159 = arith.constant 1.000000e+00 : f32
    %559 = vector.broadcast %cst_159 : f32 to vector<8x32xf32>
    %560 = arith.subf %559, %552 : vector<8x32xf32>
    %561 = arith.mulf %560, %558 : vector<8x32xf32>
    %562 = arith.addf %534, %561 : vector<8x32xf32>
    %c0_160 = arith.constant 0 : index
    %c0_161 = arith.constant 0 : index
    %563 = vector.load %arg12[%c0_160, %c0_161] : memref<32x32xf32, #tpu.memory_space<vmem>>, vector<32x32xf32>
    %cst_162 = arith.constant dense<0.000000e+00> : vector<8x32xf32>
    %564 = tpu.matmul %562, %563, %cst_162 {dimension_numbers = #tpu.dot_dimension_numbers<[1], [0], [0], [1], [0, 0, 1, 1], [], []>} : vector<8x32xf32>, vector<32x32xf32>, vector<8x32xf32> -> vector<8x32xf32>
    %c0_163 = arith.constant 0 : index
    %c0_164 = arith.constant 0 : index
    %565 = vector.load %arg13[%c0_163, %c0_164] : memref<1x32xf32, #tpu.memory_space<vmem>>, vector<1x32xf32>
    %566 = vector.broadcast %565 : vector<1x32xf32> to vector<8x32xf32>
    %567 = arith.addf %564, %566 : vector<8x32xf32>
    %c0_165 = arith.constant 0 : index
    %c0_166 = arith.constant 0 : index
    %568 = vector.load %arg14[%c0_165, %c0_166] : memref<8x32xf32, #tpu.memory_space<vmem>>, vector<8x32xf32>
    tpu.vector_store %arg14[%c0_165, %c0_166], %567 {strides = array<i32>} : memref<8x32xf32, #tpu.memory_space<vmem>>, vector<8x32xf32>,
    return
  }
}

</mosaic_0001>

<bundles_post_ra>
// kernel: encoder_rnn_pallas.1
= control target key start
LH: loop header
LB: loop body
LE: loop exit
PB: predicated region body
PF: predicated region fallthrough
CT: control target
= control target key end

     0   :  { %v1906_v0 = vmov 0   ;;  %v1907_v7 = vmov 1   ;;  %v1908_v23 = vmov 0.0   ;;  %v55_v35 = vlaneseq  ;;  %s2646_s0 = inlined_call_operand.vmem [shape: s32[64,2], index: 0, kind: input, shape index: {}]   ;;  %s2647_s3 = inlined_call_operand.vmem [shape: f32[64,192], index: 3, kind: input, shape index: {}]   ;;  %s2648_s1 = inlined_call_operand.vmem [shape: f32[32,192], index: 1, kind: input, shape index: {}]   ;;  %s2649_s4 = inlined_call_operand.vmem [shape: f32[1,64], index: 4, kind: input, shape index: {}]   ;;  %s2650_s2 = inlined_call_operand.vmem [shape: f32[1,192], index: 2, kind: input, shape index: {}]   ;;  %s2651_s8 = inlined_call_operand.vmem [shape: f32[1,32], index: 8, kind: input, shape index: {}]   ;;  %s2652_s7 = inlined_call_operand.vmem [shape: f32[32,96], index: 7, kind: input, shape index: {}]   ;;  %s2653_s5 = inlined_call_operand.vmem [shape: f32[64,96], index: 5, kind: input, shape index: {}]   ;;  %s2654_s6 = inlined_call_operand.vmem [shape: f32[1,96], index: 6, kind: input, shape index: {}]   ;;  %s2655_s9 = inlined_call_operand.vmem [shape: f32[64,96], index: 9, kind: input, shape index: {}]   ;;  %s2656_s10 = inlined_call_operand.vmem [shape: f32[1,96], index: 10, kind: input, shape index: {}]   ;;  %s2657_s11 = inlined_call_operand.vmem [shape: f32[1,32], index: 11, kind: input, shape index: {}]   ;;  %s2658_s12 = inlined_call_operand.vmem [shape: f32[32,32], index: 12, kind: input, shape index: {}]   ;;  %s2659_s13 = inlined_call_operand.vmem [shape: f32[1,32], index: 13, kind: input, shape index: {}]   ;;  %s2660_s14 = inlined_call_operand.vmem [shape: f32[8,32], index: 14, kind: output, shape index: {}]  }
   0x1   :  { %1789 = vset.pattern.permute.xlu1 %v1906_v0  ;;  %1787 = vset.pattern.permute.xlu0 %v1906_v0  ;;  %v53_v1 = vld [vmem:[%s2646_s0 + $0x30] sm:$0xff]  ;;  %v47_v2 = vld [vmem:[%s2646_s0] sm:$0xff]  ;;  %v52_v3 = vld [vmem:[%s2646_s0 + $0x28] sm:$0xff]  ;;  %vm160_vm1 = vcmask 261120   ;;  %vm268_vm7 = vcmask 523264   ;;  %vm386_vm12 = vcmask 523520  }
   0x2   :  { %85 = vperm.xlu1 %1789, %v53_v1   ;;  %67 = vperm.xlu0 %1787, %v47_v2   ;;  %v64_v4 = vadd.s32 16, %v53_v1  ;;  %v58_v5 = vadd.s32 16, %v47_v2  ;;  %v54_v6 = vld [vmem:[%s2646_s0 + $0x38] sm:$0xff]  ;;  %v63_v8 = vadd.s32 16, %v52_v3  ;;  %v48_v10 = vld [vmem:[%s2646_s0 + $0x8] sm:$0xff]  ;;  %v2013_v12 = vld [vmem:[%s2647_s3 + $0x70] sm:$0xff] }
   0x3   :  { %1791 = vset.pattern.permute.xlu2 %v1906_v0  ;;  %v65_v9 = vadd.s32 16, %v54_v6  ;;  %v59_v11 = vadd.s32 16, %v48_v10  ;;  %317 = vmatpush.msra.mxu2 %v2013_v12  ;;  %v2019_v13 = vld [vmem:[%s2647_s3 + $0x60] sm:$0xff]  ;;  %v2025_v14 = vld [vmem:[%s2647_s3 + $0x50] sm:$0xff]  ;;  %v153_v25 = vld [vmem:[%s2648_s1 + $0x38] sm:$0xff]  ;;  %v2145_v41 = vand.u32 127, %v55_v35 }
   0x4   :  { %82 = vperm.xlu2 %1791, %v52_v3   ;;  %v2031_v15 = vld [vmem:[%s2647_s3 + $0x40] sm:$0xff]  ;;  %v152_v16 = vld [vmem:[%s2648_s1 + $0x30] sm:$0xff]  ;;  %v151_v26 = vld [vmem:[%s2648_s1 + $0x28] sm:$0xff] }
   0x5   :  { %318 = vmatpush.msra.mxu2 %v2019_v13  ;;  %v150_v17 = vld [vmem:[%s2648_s1 + $0x20] sm:$0xff]  ;;  %197 = vmatpush.msra.mxu0 %v152_v16  ;;  %v2043_v18 = vld [vmem:[%s2647_s3 + $0x30] sm:$0xff]  ;;  %v2090_v27 = vld [vmem:[%s2647_s3 + $0x78] sm:$0xff]  ;;  %vm57_vm0 = vcmp.lt.s32.totalorder %v2145_v41, 16 }
   0x6   :  { %1775 = vmatpush.msra.mxu3 %v152_v16  ;;  %1774 = vmatpush.msra.mxu1 %v152_v16  ;;  %v2049_v19 = vld [vmem:[%s2647_s3 + $0x20] sm:$0xff]  ;;  %v2055_v20 = vld [vmem:[%s2647_s3 + $0x10] sm:$0xff]  ;;  %v149_v29 = vld [vmem:[%s2648_s1 + $0x18] sm:$0xff] }
   0x7   :  { %319 = vmatpush.msra.mxu2 %v2025_v14  ;;  %198 = vmatpush.msra.mxu0 %v150_v17  ;;  %v2061_v21 = vld [vmem:[%s2647_s3] sm:$0xff]  ;;  %v148_v22 = vld [vmem:[%s2648_s1 + $0x10] sm:$0xff]  ;;  %v2100_v30 = vld [vmem:[%s2647_s3 + $0x68] sm:$0xff] }
   0x8   :  { %1777 = vmatpush.msra.mxu3 %v150_v17  ;;  %1776 = vmatpush.msra.mxu1 %v150_v17  ;;  %v146_v24 = vld [vmem:[%s2648_s1] sm:$0xff]  ;;  %v147_v31 = vld [vmem:[%s2648_s1 + $0x8] sm:$0xff]  ;;  %v2111_v32 = vld [vmem:[%s2647_s3 + $0x58] sm:$0xff] }
   0x9   :  { %320 = vmatpush.msra.mxu2 %v2031_v15  ;;  %199 = vmatpush.msra.mxu0 %v148_v22  ;;  %v2119_v33 = vld [vmem:[%s2647_s3 + $0x48] sm:$0xff]  ;;  %v2127_v34 = vld [vmem:[%s2647_s3 + $0x38] sm:$0xff]  ;;  %v154_v59 = vld [vmem:[%s2650_s2] sm:$0x3] }
   0xa   :  { %1790 = vset.pattern.permute.xlu1 %v1907_v7  ;;  %1788 = vset.pattern.permute.xlu0 %v1907_v7  ;;  %v2135_v36 = vld [vmem:[%s2647_s3 + $0x28] sm:$0xff]  ;;  %v2142_v40 = vld [vmem:[%s2647_s3 + $0x18] sm:$0xff]  ;;  %v2238_v60 = vperm.slane %v154_v59, 0  ;;  %v2261_v35 = vld [vmem:[%s2649_s4] ss:$0 sm:$0xff]  ;;  %s1909_s4 = smov 64  }
   0xb   :  { %109 = vperm.xlu1 %1790, %v64_v4   ;;  %91 = vperm.xlu0 %1788, %v58_v5   ;;  %v2151_v42 = vld [vmem:[%s2647_s3 + $0x8] sm:$0xff] }
   0xc   :  { %88 = vperm.xlu2 %1791, %v54_v6   ;;  %321 = vmatpush.msra.mxu2 %v2043_v18 }
   0xd   :  { %1779 = vmatpush.msra.mxu3 %v148_v22  ;;  %1778 = vmatpush.msra.mxu1 %v148_v22 }
   0xe   :  { %322 = vmatpush.msra.mxu2 %v2049_v19  ;;  %200 = vmatpush.msra.mxu0 %v146_v24 }
   0xf   :  { %1781 = vmatpush.msra.mxu3 %v146_v24  ;;  %1780 = vmatpush.msra.mxu1 %v146_v24 }
  0x10   :  { %323 = vmatpush.msra.mxu2 %v2055_v20  ;;  %646 = vmatpush.msrb.mxu0 %v2013_v12 }
  0x11   :  { %238 = vmatpush.msrb.mxu1 %v153_v25  ;;  %337 = vmatpush.msrb.mxu3 %v2090_v27 }
  0x12   :  { %324 = vmatpush.msra.mxu2 %v2061_v21  ;;  %647 = vmatpush.msrb.mxu0 %v2019_v13 }
  0x13   :  { %106 = vperm.xlu1 %1790, %v63_v8   ;;  %325 = vmatmul.f32.vlgmr.msra.gmra.mxu2 %v1908_v23 }
  0x14   :  { %1792 = vset.pattern.permute.xlu2 %v1907_v7  ;;  %400 = vmatpush.msrb.mxu2 %v2013_v12 }
  0x15   :  { %112 = vperm.xlu2 %1792, %v65_v9   ;;  %648 = vmatpush.msrb.mxu0 %v2025_v14  ;;  %v2247_v9 = vperm.slane %v154_v59, 1 }
  0x16   :  { %401 = vmatpush.msrb.mxu2 %v2019_v13  ;;  %239 = vmatpush.msrb.mxu1 %v151_v26 }
  0x17   :  { %649 = vmatpush.msrb.mxu0 %v2031_v15  ;;  %338 = vmatpush.msrb.mxu3 %v2100_v30 }
  0x18   :  { %402 = vmatpush.msrb.mxu2 %v2025_v14  ;;  %240 = vmatpush.msrb.mxu1 %v149_v29 }
  0x19   :  { %650 = vmatpush.msrb.mxu0 %v2043_v18  ;;  %339 = vmatpush.msrb.mxu3 %v2111_v32 }
  0x1a   :  { %403 = vmatpush.msrb.mxu2 %v2031_v15  ;;  %241 = vmatpush.msrb.mxu1 %v147_v31 }
  0x1b   :  { %1793 = vset.pattern.permute.xlu1 %v1906_v0  ;;  %651 = vmatpush.msrb.mxu0 %v2049_v19 }
  0x1c   :  { %70 = vperm.xlu1 %1793, %v48_v10   ;;  %404 = vmatpush.msrb.mxu2 %v2043_v18 }
  0x1d   :  { %94 = vperm.xlu2 %1792, %v59_v11   ;;  %652 = vmatpush.msrb.mxu0 %v2055_v20 }
  0x1e   :  { %405 = vmatpush.msrb.mxu2 %v2049_v19  ;;  %340 = vmatpush.msrb.mxu3 %v2119_v33 }
  0x1f   :  { %653 = vmatpush.msrb.mxu0 %v2061_v21 }
  0x20   :  { %406 = vmatpush.msrb.mxu2 %v2055_v20  ;;  %341 = vmatpush.msrb.mxu3 %v2127_v34 }
  0x22   :  { %407 = vmatpush.msrb.mxu2 %v2061_v21  ;;  %342 = vmatpush.msrb.mxu3 %v2135_v36 }
  0x24   :  { %1796 = vset.pattern.permute.xlu1 %v1907_v7  ;;  %482 = vmatpush.msra.mxu2 %v2013_v12 }
  0x25   :  { %1794 = vset.pattern.permute.xlu2 %v1906_v0  ;;  %343 = vmatpush.msrb.mxu3 %v2142_v40 }
  0x26   :  { %483 = vmatpush.msra.mxu2 %v2019_v13 }
  0x27   :  { %344 = vmatpush.msrb.mxu3 %v2151_v42 }
  0x28   :  { %484 = vmatpush.msra.mxu2 %v2025_v14 }
  0x2a   :  { %485 = vmatpush.msra.mxu2 %v2031_v15 }
  0x2c   :  { %486 = vmatpush.msra.mxu2 %v2043_v18 }
  0x2e   :  { %487 = vmatpush.msra.mxu2 %v2049_v19 }
  0x30   :  { %488 = vmatpush.msra.mxu2 %v2055_v20 }
  0x32   :  { %489 = vmatpush.msra.mxu2 %v2061_v21 }
  0x5e   :  { %v83_v28 = vpop.permute.xlu2 %82 }
  0x66   :  { %v89_v39 = vpop.permute.xlu2 %88 }
  0x6f   :  { %v113_v47 = vpop.permute.xlu2 %112 }
  0x70   :  { %v121_v50 = vsel %vm57_vm0, %v89_v39, %v113_v47 }
  0x71   :  { %vm129_vm4 = vcmp.eq.s32.totalorder %v2145_v41, %v121_v50 }
  0x72   :  { %v2187_v54 = vsel %vm129_vm4, 1.0, %v1908_v23 }
  0x74   :  { %v68_v37 = vpop.permute.xlu0 %67  ;;  %v86_v38 = vpop.permute.xlu1 %85 }
  0x77   :  { %v95_v55 = vpop.permute.xlu2 %94 }
  0x7d   :  { %v110_v43 = vpop.permute.xlu1 %109  ;;  %v92_v44 = vpop.permute.xlu0 %91 }
  0x7e   :  { %v120_v45 = vsel %vm57_vm0, %v86_v38, %v110_v43  ;;  %v114_v46 = vsel %vm57_vm0, %v68_v37, %v92_v44 }
  0x7f   :  { %vm122_vm2 = vcmp.eq.s32.totalorder %v2145_v41, %v114_v46  ;;  %vm128_vm3 = vcmp.eq.s32.totalorder %v2145_v41, %v120_v45 }
  0x80   :  { %v1702_v48 = vsel %vm122_vm2, 1.0, %v1908_v23  ;;  %v2166_v49 = vsel %vm128_vm3, 1.0, %v1908_v23 }
  0x81   :  { %1710 = vmatmul.msk.f32.vlgmr.msra.gmra.mxu0 %vm160_vm1, %v1702_v48  ;;  %1716 = vmatmul.msk.f32.vlgmr.msra.gmra.mxu3 %vm160_vm1, %v2166_v49 }
  0x82   :  { %420 = vmatpush.msra.mxu3 %v2090_v27  ;;  %810 = vmatpush.msra.mxu0 %v2013_v12 }
  0x84   :  { %421 = vmatpush.msra.mxu3 %v2100_v30  ;;  %811 = vmatpush.msra.mxu0 %v2019_v13 }
  0x85   :  { %v107_v51 = vpop.permute.xlu1 %106 }
  0x86   :  { %v119_v52 = vsel %vm57_vm0, %v83_v28, %v107_v51  ;;  %422 = vmatpush.msra.mxu3 %v2111_v32  ;;  %812 = vmatpush.msra.mxu0 %v2025_v14 }
  0x87   :  { %vm127_vm5 = vcmp.eq.s32.totalorder %v2145_v41, %v119_v52 }
  0x88   :  { %v2184_v53 = vsel %vm127_vm5, 1.0, %v1908_v23  ;;  %423 = vmatpush.msra.mxu3 %v2119_v33  ;;  %813 = vmatpush.msra.mxu0 %v2031_v15 }
  0x89   :  { %1715 = vmatmul.msk.f32.vlgmr.msra.gmra.mxu1 %vm160_vm1, %v2184_v53  ;;  %1717 = vmatmul.msk.f32.gmra.mxu3 %vm160_vm1, %v2187_v54 }
  0x8a   :  { %424 = vmatpush.msra.mxu3 %v2127_v34  ;;  %666 = vmatpush.msra.mxu1 %v2090_v27 }
  0x8b   :  { %814 = vmatpush.msra.mxu0 %v2043_v18 }
  0x8c   :  { %425 = vmatpush.msra.mxu3 %v2135_v36  ;;  %667 = vmatpush.msra.mxu1 %v2100_v30 }
  0x8d   :  { %815 = vmatpush.msra.mxu0 %v2049_v19 }
  0x8e   :  { %v71_v56 = vpop.permute.xlu1 %70  ;;  %426 = vmatpush.msra.mxu3 %v2142_v40  ;;  %668 = vmatpush.msra.mxu1 %v2111_v32 }
  0x8f   :  { %v115_v57 = vsel %vm57_vm0, %v71_v56, %v95_v55  ;;  %816 = vmatpush.msra.mxu0 %v2055_v20 }
  0x90   :  { %vm123_vm6 = vcmp.eq.s32.totalorder %v2145_v41, %v115_v57  ;;  %427 = vmatpush.msra.mxu3 %v2151_v42  ;;  %669 = vmatpush.msra.mxu1 %v2119_v33  ;;  %v49_v57 = vld [vmem:[%s2646_s0 + $0x10] sm:$0xff] }
  0x91   :  { %1718 = vmatmul.msk.f32.vlgmr.msrb.gmra.mxu1 %vm160_vm1, %v1702_v48  ;;  %v1703_v58 = vsel %vm123_vm6, 1.0, %v1908_v23  ;;  %345 = vmatmul.f32.vlgmr.msrb.gmra.mxu3 %v1908_v23 }
  0x92   :  { %1711 = vmatmul.msk.f32.gmra.mxu0 %vm160_vm1, %v1703_v58  ;;  %502 = vmatpush.msrb.mxu3 %v2090_v27 }
  0x93   :  { %670 = vmatpush.msra.mxu1 %v2127_v34  ;;  %817 = vmatpush.msra.mxu0 %v2061_v21 }
  0x94   :  { %503 = vmatpush.msrb.mxu3 %v2100_v30  ;;  %73 = vperm.xlu2 %1794, %v49_v57  }
  0x95   :  { %671 = vmatpush.msra.mxu1 %v2135_v36 }
  0x96   :  { %504 = vmatpush.msrb.mxu3 %v2111_v32  ;;  %v326_v62 = vpop.f32.mrf.mxu2 }
  0x97   :  { %672 = vmatpush.msra.mxu1 %v2142_v40 }
  0x98   :  { %505 = vmatpush.msrb.mxu3 %v2119_v33 }
  0x99   :  { %1719 = vmatmul.msk.f32.gmra.mxu1 %vm160_vm1, %v1703_v58 }
  0x9a   :  { %506 = vmatpush.msrb.mxu3 %v2127_v34  ;;  %673 = vmatpush.msra.mxu1 %v2151_v42 }
  0x9c   :  { %830 = vmatpush.msrb.mxu1 %v2090_v27  ;;  %507 = vmatpush.msrb.mxu3 %v2135_v36 }
  0x9e   :  { %831 = vmatpush.msrb.mxu1 %v2100_v30  ;;  %508 = vmatpush.msrb.mxu3 %v2142_v40 }
  0xa0   :  { %832 = vmatpush.msrb.mxu1 %v2111_v32  ;;  %509 = vmatpush.msrb.mxu3 %v2151_v42 }
  0xa2   :  { %833 = vmatpush.msrb.mxu1 %v2119_v33 }
  0xa4   :  { %834 = vmatpush.msrb.mxu1 %v2127_v34 }
  0xa6   :  { %835 = vmatpush.msrb.mxu1 %v2135_v36 }
  0xa8   :  { %836 = vmatpush.msrb.mxu1 %v2142_v40 }
  0xaa   :  { %837 = vmatpush.msrb.mxu1 %v2151_v42 }
  0xfe   :  { %v202_v61 = vpop.f32.mrf.mxu0 }
  0xff   :  { %v203_v63 = vadd.f32 %v202_v61, %v2238_v60 }
 0x101   :  { %v349_v1 = vadd.f32 %v326_v62, %v203_v63 }
 0x103   :  { %v1726_v2 = vmul.f32 -1.442695, %v349_v1  ;;  %v60_v1 = vadd.s32 16, %v49_v57 }
 0x104   :  { %v220_v3 = vpop.f32.mrf.mxu3 }
 0x105   :  { %v2242_v4 = vadd.f32 %v220_v3, %v2238_v60  ;;  %1804 = vpow2.f32 %v1726_v2  ;;  %v74_v3 = vpop.permute.xlu2 %73 }
 0x106   :  { %v217_v5 = vpop.f32.mrf.mxu1 }
 0x107   :  { %v2245_v6 = vadd.f32 %v217_v5, %v2238_v60 }
 0x10b   :  { %v1805_v8 = vpop.eup %1804 }
 0x10c   :  { %v353_v10 = vadd.f32 1.0, %v1805_v8  ;;  %v223_v11 = vpop.f32.mrf.mxu3 }
 0x10d   :  { %v2250_v16 = vadd.f32 %v223_v11, %v2238_v60 }
 0x10e   :  { %1806 = vrcp.f32 %v353_v10  ;;  %v243_v17 = vpop.f32.mrf.mxu1  ;;  %v365_v39 = vand.u32 2147483648, %v353_v10  ;;  %v363_v44 = vand.u32 2147483647, %v353_v10  ;;  %vm359_vm9 = vweird.f32 %v353_v10 }
 0x10f   :  { %v244_v22 = vadd.f32 %v243_v17, %v2247_v9  ;;  %v205_v24 = vpop.f32.mrf.mxu0 }
 0x110   :  { %v2254_v25 = vadd.f32 %v205_v24, %v2238_v60  ;;  %v366_v47 = vor.u32 1.1754944e-38, %v365_v39  ;;  %vm364_vm11 = vcmp.eq.f32.partialorder %v363_v44, 8.507059e+37 }
 0x111   :  { %269 = vst.msk [vmem:[#allocation2 + $0x8] sm:$0xff] %vm268_vm7, %v244_v22 }
 0x114   :  { %v1807_v26 = vpop.eup %1806  ;;  %v346_v38 = vpop.f32.mrf.mxu3 }
 0x115   :  { %v355_v28 = vmul.f32 %v1807_v26, %v353_v10  ;;  %vm360_vm8 = vweird.f32 %v1807_v26  ;;  %v369_v46 = vadd.f32 %v2261_v35, %v346_v38 }
 0x116   :  { %v246_v29 = vpop.f32.mrf.mxu1  ;;  %vm361_vm10 = vmor %vm359_vm9, %vm360_vm8 }
 0x117   :  { %v247_v31 = vadd.f32 %v246_v29, %v2247_v9  ;;  %v356_v37 = vsub.f32 1.0, %v355_v28 }
 0x118   :  { %v305_v52 = vld [vmem:[#allocation2 + $0x8] sm:$0xff] }
 0x119   :  { %271 = vst.msk [vmem:[#allocation2 + $0x18] sm:$0xff] %vm268_vm7, %v247_v31  ;;  %v357_v43 = vmul.f32 %v1807_v26, %v356_v37 }
 0x11b   :  { %v358_v45 = vadd.f32 %v1807_v26, %v357_v43 }
 0x11d   :  { %v362_v48 = vsel %vm361_vm10, %v1807_v26, %v358_v45 }
 0x11e   :  { %v367_v50 = vsel %vm364_vm11, %v366_v47, %v362_v48 }
 0x11f   :  { %v370_v51 = vmul.f32 %v369_v46, %v367_v50  ;;  %v373_v58 = vsub.f32 1.0, %v367_v50  ;;  %v379_v61 = vmul.f32 0.0, %v367_v50 }
 0x121   :  { %v371_v55 = vadd.f32 %v370_v51, %v305_v52 }
 0x123   :  { %1808 = vtanh.f32 %v371_v55  ;;  %v389_v55 = vld [vmem:[#allocation2 + $0x18] sm:$0xff] }
 0x129   :  { %v1809_v56 = vpop.eup %1808 }
 0x12a   :  { %375 = vrot.lane.b32.xlu0 %v1809_v56, %s1909_s4 }
 0x19c   :  { %v376_v59 = vpop.permute.xlu0 %375 }
 0x19d   :  { %v378_v62 = vmul.f32 %v376_v59, %v373_v58 }
 0x19f   :  { %v2269_v63 = vadd.f32 %v379_v61, %v378_v62 }
 0x1a1   :  { %382 = vrot.lane.b32.xlu0 %v2269_v63, %s1909_s4 }
 0x1a9   :  { %97 = vperm.xlu0 %1788, %v60_v1  }
 0x1b1   :  { %1795 = vset.pattern.permute.xlu0 %v1906_v0 }
 0x213   :  { %v383_v2 = vpop.permute.xlu0 %382 }
 0x214   :  { %385 = vst.msk [vmem:[#allocation3] sm:$0xff] %vm160_vm1, %v383_v2  ;;  %1727 = vmatmul.msk.f32.vlgmr.msrb.gmra.mxu2 %vm268_vm7, %v383_v2  ;;  %1728 = vmatmul.msk.f32.vlgmr.msra.gmra.mxu3 %vm268_vm7, %v383_v2 }
 0x215   :  { %387 = vst.msk [vmem:[#allocation3 + $0x38] sm:$0xff] %vm386_vm12, %v383_v2  ;;  %564 = vmatpush.msrb.mxu2 %v2013_v12  ;;  %584 = vmatpush.msra.mxu3 %v2090_v27 }
 0x217   :  { %565 = vmatpush.msrb.mxu2 %v2019_v13  ;;  %585 = vmatpush.msra.mxu3 %v2100_v30 }
 0x219   :  { %566 = vmatpush.msrb.mxu2 %v2025_v14  ;;  %586 = vmatpush.msra.mxu3 %v2111_v32 }
 0x21b   :  { %v98_v0 = vpop.permute.xlu0 %97  ;;  %567 = vmatpush.msrb.mxu2 %v2031_v15  ;;  %587 = vmatpush.msra.mxu3 %v2119_v33 }
 0x21c   :  { %v116_v5 = vsel %vm57_vm0, %v74_v3, %v98_v0 }
 0x21d   :  { %vm124_vm13 = vcmp.eq.s32.totalorder %v2145_v41, %v116_v5  ;;  %568 = vmatpush.msrb.mxu2 %v2043_v18  ;;  %588 = vmatpush.msra.mxu3 %v2127_v34  ;;  %v50_v5 = vld [vmem:[%s2646_s0 + $0x18] sm:$0xff] }
 0x21e   :  { %v1704_v8 = vsel %vm124_vm13, 1.0, %v1908_v23  ;;  %76 = vperm.xlu0 %1795, %v50_v5  }
 0x21f   :  { %1712 = vmatmul.msk.f32.gmra.mxu0 %vm160_vm1, %v1704_v8  ;;  %1720 = vmatmul.msk.f32.gmra.mxu1 %vm160_vm1, %v1704_v8 }
 0x220   :  { %569 = vmatpush.msrb.mxu2 %v2049_v19  ;;  %589 = vmatpush.msra.mxu3 %v2135_v36 }
 0x222   :  { %570 = vmatpush.msrb.mxu2 %v2055_v20  ;;  %590 = vmatpush.msra.mxu3 %v2142_v40 }
 0x224   :  { %571 = vmatpush.msrb.mxu2 %v2061_v21  ;;  %591 = vmatpush.msra.mxu3 %v2151_v42 }
 0x226   :  { %1797 = vset.pattern.permute.xlu0 %v1907_v7 }
 0x297   :  { %v409_v10 = vpop.f32.mrf.mxu2  ;;  %v429_v45 = vpop.f32.mrf.mxu3 }
 0x298   :  { %v432_v11 = vadd.f32 %v409_v10, %v2254_v25  ;;  %v452_v50 = vadd.f32 %v2261_v35, %v429_v45  ;;  %v61_v10 = vadd.s32 16, %v50_v5 }
 0x29a   :  { %v1729_v17 = vmul.f32 -1.442695, %v432_v11 }
 0x29c   :  { %1810 = vpow2.f32 %v1729_v17  ;;  %v208_v22 = vpop.f32.mrf.mxu0  ;;  %v249_v24 = vpop.f32.mrf.mxu1  ;;  %v51_v17 = vld [vmem:[%s2646_s0 + $0x20] sm:$0xff] }
 0x29d   :  { %v209_v26 = vadd.f32 %v208_v22, %v2238_v60  ;;  %v250_v28 = vadd.f32 %v249_v24, %v2247_v9  ;;  %v62_v22 = vadd.s32 16, %v51_v17 }
 0x29f   :  { %273 = vst.msk [vmem:[#allocation2 + $0x28] sm:$0xff] %vm268_vm7, %v250_v28  ;;  %103 = vperm.xlu0 %1797, %v62_v22  }
 0x2a2   :  { %v1811_v29 = vpop.eup %1810 }
 0x2a3   :  { %v436_v31 = vadd.f32 1.0, %v1811_v29 }
 0x2a5   :  { %1812 = vrcp.f32 %v436_v31  ;;  %v448_v43 = vand.u32 2147483648, %v436_v31  ;;  %v446_v25 = vand.u32 2147483647, %v436_v31  ;;  %vm442_vm15 = vweird.f32 %v436_v31 }
 0x2a6   :  { %v471_v7 = vld [vmem:[#allocation2 + $0x28] sm:$0xff] }
 0x2a7   :  { %v449_v47 = vor.u32 1.1754944e-38, %v448_v43  ;;  %vm447_vm3 = vcmp.eq.f32.partialorder %v446_v25, 8.507059e+37 }
 0x2ab   :  { %v1813_v37 = vpop.eup %1812 }
 0x2ac   :  { %v438_v38 = vmul.f32 %v1813_v37, %v436_v31  ;;  %vm443_vm14 = vweird.f32 %v1813_v37 }
 0x2ad   :  { %vm444_vm2 = vmor %vm442_vm15, %vm443_vm14 }
 0x2ae   :  { %v439_v39 = vsub.f32 1.0, %v438_v38 }
 0x2b0   :  { %v440_v44 = vmul.f32 %v1813_v37, %v439_v39 }
 0x2b2   :  { %v441_v46 = vadd.f32 %v1813_v37, %v440_v44 }
 0x2b4   :  { %v445_v48 = vsel %vm444_vm2, %v1813_v37, %v441_v46 }
 0x2b5   :  { %v450_v51 = vsel %vm447_vm3, %v449_v47, %v445_v48 }
 0x2b6   :  { %v453_v52 = vmul.f32 %v452_v50, %v450_v51  ;;  %v456_v58 = vsub.f32 1.0, %v450_v51  ;;  %v462_v61 = vmul.f32 %v450_v51, %v2269_v63  ;;  %v77_v50 = vpop.permute.xlu0 %76 }
 0x2b8   :  { %v454_v56 = vadd.f32 %v453_v52, %v389_v55 }
 0x2ba   :  { %1814 = vtanh.f32 %v454_v56 }
 0x2c0   :  { %v1815_v57 = vpop.eup %1814 }
 0x2c1   :  { %458 = vrot.lane.b32.xlu1 %v1815_v57, %s1909_s4 }
 0x333   :  { %v459_v59 = vpop.permute.xlu1 %458 }
 0x334   :  { %v461_v62 = vmul.f32 %v459_v59, %v456_v58 }
 0x336   :  { %v2307_v1 = vadd.f32 %v462_v61, %v461_v62 }
 0x338   :  { %465 = vrot.lane.b32.xlu1 %v2307_v1, %s1909_s4 }
 0x340   :  { %100 = vperm.xlu1 %1796, %v61_v10  }
 0x3aa   :  { %v466_v2 = vpop.permute.xlu1 %465 }
 0x3ab   :  { %468 = vst.msk [vmem:[#allocation3 + $0x8] sm:$0xff] %vm160_vm1, %v466_v2  ;;  %1730 = vmatmul.msk.f32.vlgmr.msra.gmra.mxu2 %vm268_vm7, %v466_v2  ;;  %1731 = vmatmul.msk.f32.vlgmr.msrb.gmra.mxu3 %vm268_vm7, %v466_v2 }
 0x3ac   :  { %469 = vst.msk [vmem:[#allocation3 + $0x30] sm:$0xff] %vm386_vm12, %v466_v2  ;;  %728 = vmatpush.msra.mxu2 %v2013_v12  ;;  %748 = vmatpush.msrb.mxu3 %v2090_v27 }
 0x3ae   :  { %729 = vmatpush.msra.mxu2 %v2019_v13  ;;  %749 = vmatpush.msrb.mxu3 %v2100_v30 }
 0x3b0   :  { %730 = vmatpush.msra.mxu2 %v2025_v14  ;;  %750 = vmatpush.msrb.mxu3 %v2111_v32 }
 0x3b2   :  { %731 = vmatpush.msra.mxu2 %v2031_v15  ;;  %751 = vmatpush.msrb.mxu3 %v2119_v33  ;;  %v101_v51 = vpop.permute.xlu1 %100 }
 0x3b3   :  { %v117_v52 = vsel %vm57_vm0, %v77_v50, %v101_v51 }
 0x3b4   :  { %732 = vmatpush.msra.mxu2 %v2043_v18  ;;  %752 = vmatpush.msrb.mxu3 %v2127_v34  ;;  %vm125_vm9 = vcmp.eq.s32.totalorder %v2145_v41, %v117_v52 }
 0x3b5   :  { %v1705_v55 = vsel %vm125_vm9, 1.0, %v1908_v23 }
 0x3b6   :  { %733 = vmatpush.msra.mxu2 %v2049_v19  ;;  %753 = vmatpush.msrb.mxu3 %v2135_v36 }
 0x3b7   :  { %1713 = vmatmul.msk.f32.gmra.mxu0 %vm160_vm1, %v1705_v55  ;;  %1721 = vmatmul.msk.f32.gmra.mxu1 %vm160_vm1, %v1705_v55 }
 0x3b8   :  { %734 = vmatpush.msra.mxu2 %v2055_v20  ;;  %754 = vmatpush.msrb.mxu3 %v2142_v40 }
 0x3ba   :  { %735 = vmatpush.msra.mxu2 %v2061_v21  ;;  %755 = vmatpush.msrb.mxu3 %v2151_v42 }
 0x42e   :  { %v491_v63 = vpop.f32.mrf.mxu2  ;;  %v511_v38 = vpop.f32.mrf.mxu3 }
 0x42f   :  { %v514_v3 = vadd.f32 %v491_v63, %v209_v26  ;;  %v534_v25 = vadd.f32 %v2261_v35, %v511_v38 }
 0x431   :  { %v1732_v0 = vmul.f32 -1.442695, %v514_v3 }
 0x433   :  { %1816 = vpow2.f32 %v1732_v0 }
 0x439   :  { %v1817_v8 = vpop.eup %1816 }
 0x43a   :  { %v518_v11 = vadd.f32 1.0, %v1817_v8 }
 0x43c   :  { %1818 = vrcp.f32 %v518_v11  ;;  %v530_v29 = vand.u32 2147483648, %v518_v11  ;;  %v528_v37 = vand.u32 2147483647, %v518_v11  ;;  %vm524_vm5 = vweird.f32 %v518_v11 }
 0x43e   :  { %v531_v43 = vor.u32 1.1754944e-38, %v530_v29  ;;  %vm529_vm8 = vcmp.eq.f32.partialorder %v528_v37, 8.507059e+37 }
 0x442   :  { %v1819_v24 = vpop.eup %1818 }
 0x443   :  { %v520_v26 = vmul.f32 %v1819_v24, %v518_v11  ;;  %vm525_vm4 = vweird.f32 %v1819_v24 }
 0x444   :  { %vm526_vm6 = vmor %vm524_vm5, %vm525_vm4 }
 0x445   :  { %v521_v28 = vsub.f32 1.0, %v520_v26 }
 0x447   :  { %v522_v31 = vmul.f32 %v1819_v24, %v521_v28 }
 0x449   :  { %v523_v39 = vadd.f32 %v1819_v24, %v522_v31 }
 0x44b   :  { %v527_v44 = vsel %vm526_vm6, %v1819_v24, %v523_v39 }
 0x44c   :  { %v532_v45 = vsel %vm529_vm8, %v531_v43, %v527_v44 }
 0x44d   :  { %v535_v46 = vmul.f32 %v534_v25, %v532_v45  ;;  %v538_v56 = vsub.f32 1.0, %v532_v45  ;;  %v544_v58 = vmul.f32 %v532_v45, %v2307_v1  ;;  %v104_v1 = vpop.permute.xlu0 %103 }
 0x44f   :  { %v536_v47 = vadd.f32 %v535_v46, %v471_v7 }
 0x451   :  { %1820 = vtanh.f32 %v536_v47 }
 0x457   :  { %v1821_v48 = vpop.eup %1820 }
 0x458   :  { %540 = vrot.lane.b32.xlu2 %v1821_v48, %s1909_s4 }
 0x4b2   :  { %v541_v57 = vpop.permute.xlu2 %540 }
 0x4b3   :  { %v543_v59 = vmul.f32 %v541_v57, %v538_v56 }
 0x4b5   :  { %v2347_v61 = vadd.f32 %v544_v58, %v543_v59 }
 0x4b7   :  { %547 = vrot.lane.b32.xlu2 %v2347_v61, %s1909_s4 }
 0x4bf   :  { %79 = vperm.xlu2 %1794, %v51_v17  }
 0x511   :  { %v548_v62 = vpop.permute.xlu2 %547 }
 0x512   :  { %550 = vst.msk [vmem:[#allocation3 + $0x10] sm:$0xff] %vm160_vm1, %v548_v62  ;;  %1733 = vmatmul.msk.f32.vlgmr.msrb.gmra.mxu2 %vm268_vm7, %v548_v62  ;;  %1734 = vmatmul.msk.f32.vlgmr.msra.gmra.mxu3 %vm268_vm7, %v548_v62 }
 0x513   :  { %551 = vst.msk [vmem:[#allocation3 + $0x28] sm:$0xff] %vm386_vm12, %v548_v62  ;;  %892 = vmatpush.msrb.mxu2 %v2013_v12  ;;  %912 = vmatpush.msra.mxu3 %v2090_v27 }
 0x515   :  { %893 = vmatpush.msrb.mxu2 %v2019_v13  ;;  %913 = vmatpush.msra.mxu3 %v2100_v30  ;;  %v211_v13 = vpop.f32.mrf.mxu0 }
 0x517   :  { %894 = vmatpush.msrb.mxu2 %v2025_v14  ;;  %914 = vmatpush.msra.mxu3 %v2111_v32  ;;  %v252_v14 = vpop.f32.mrf.mxu1 }
 0x519   :  { %v80_v2 = vpop.permute.xlu2 %79  ;;  %895 = vmatpush.msrb.mxu2 %v2031_v15  ;;  %915 = vmatpush.msra.mxu3 %v2119_v33  ;;  %v212_v15 = vadd.f32 %v211_v13, %v2238_v60 }
 0x51a   :  { %v118_v63 = vsel %vm57_vm0, %v80_v2, %v104_v1 }
 0x51b   :  { %vm126_vm10 = vcmp.eq.s32.totalorder %v2145_v41, %v118_v63  ;;  %896 = vmatpush.msrb.mxu2 %v2043_v18  ;;  %916 = vmatpush.msra.mxu3 %v2127_v34  ;;  %v253_v18 = vadd.f32 %v252_v14, %v2247_v9 }
 0x51c   :  { %v1706_v12 = vsel %vm126_vm10, 1.0, %v1908_v23 }
 0x51d   :  { %1714 = vmatmul.msk.f32.gmra.mxu0 %vm160_vm1, %v1706_v12  ;;  %1722 = vmatmul.msk.f32.gmra.mxu1 %vm160_vm1, %v1706_v12  ;;  %275 = vst.msk [vmem:[#allocation2 + $0x38] sm:$0xff] %vm268_vm7, %v253_v18 }
 0x51e   :  { %897 = vmatpush.msrb.mxu2 %v2049_v19  ;;  %917 = vmatpush.msra.mxu3 %v2135_v36 }
 0x520   :  { %898 = vmatpush.msrb.mxu2 %v2055_v20  ;;  %918 = vmatpush.msra.mxu3 %v2142_v40 }
 0x522   :  { %899 = vmatpush.msrb.mxu2 %v2061_v21  ;;  %919 = vmatpush.msra.mxu3 %v2151_v42 }
 0x524   :  { %v553_v31 = vld [vmem:[#allocation2 + $0x38] sm:$0xff] }
 0x525   :  { %1723 = vmatmul.msk.f32.gmra.mxu1 %vm160_vm1, %v2184_v53 }
 0x52d   :  { %1724 = vmatmul.msk.f32.gmra.mxu1 %vm160_vm1, %v2166_v49 }
 0x535   :  { %1725 = vmatmul.msk.f32.gmra.mxu1 %vm160_vm1, %v2187_v54 }
 0x595   :  { %v573_v19 = vpop.f32.mrf.mxu2  ;;  %v593_v8 = vpop.f32.mrf.mxu3 }
 0x596   :  { %v596_v20 = vadd.f32 %v573_v19, %v212_v15  ;;  %v616_v22 = vadd.f32 %v2261_v35, %v593_v8 }
 0x598   :  { %v1735_v21 = vmul.f32 -1.442695, %v596_v20 }
 0x59a   :  { %1822 = vpow2.f32 %v1735_v21  ;;  %v214_v27 = vpop.f32.mrf.mxu0  ;;  %v255_v30 = vpop.f32.mrf.mxu1 }
 0x59b   :  { %v215_v32 = vadd.f32 %v214_v27, %v2238_v60  ;;  %v256_v33 = vadd.f32 %v255_v30, %v2247_v9 }
 0x59d   :  { %277 = vst.msk [vmem:[#allocation2 + $0x48] sm:$0xff] %vm268_vm7, %v256_v33 }
 0x5a0   :  { %v1823_v34 = vpop.eup %1822 }
 0x5a1   :  { %v600_v36 = vadd.f32 1.0, %v1823_v34 }
 0x5a2   :  { %v258_v40 = vpop.f32.mrf.mxu1 }
 0x5a3   :  { %1824 = vrcp.f32 %v600_v36  ;;  %v259_v41 = vadd.f32 %v258_v40, %v2247_v9  ;;  %v612_v0 = vand.u32 2147483648, %v600_v36  ;;  %v610_v5 = vand.u32 2147483647, %v600_v36 }
 0x5a4   :  { %vm606_vm11 = vweird.f32 %v600_v36  ;;  %v635_v13 = vld [vmem:[#allocation2 + $0x48] sm:$0xff] }
 0x5a5   :  { %279 = vst.msk [vmem:[#allocation2 + $0x58] sm:$0xff] %vm268_vm7, %v259_v41  ;;  %v613_v11 = vor.u32 1.1754944e-38, %v612_v0  ;;  %vm611_vm14 = vcmp.eq.f32.partialorder %v610_v5, 8.507059e+37 }
 0x5a9   :  { %v1825_v42 = vpop.eup %1824 }
 0x5aa   :  { %v602_v49 = vmul.f32 %v1825_v42, %v600_v36  ;;  %v261_v53 = vpop.f32.mrf.mxu1  ;;  %vm607_vm0 = vweird.f32 %v1825_v42 }
 0x5ab   :  { %v262_v54 = vadd.f32 %v261_v53, %v2247_v9  ;;  %vm608_vm13 = vmor %vm606_vm11, %vm607_vm0 }
 0x5ac   :  { %v603_v3 = vsub.f32 1.0, %v602_v49 }
 0x5ad   :  { %281 = vst.msk [vmem:[#allocation2 + $0x68] sm:$0xff] %vm268_vm7, %v262_v54 }
 0x5ae   :  { %v604_v60 = vmul.f32 %v1825_v42, %v603_v3 }
 0x5b0   :  { %v605_v10 = vadd.f32 %v1825_v42, %v604_v60 }
 0x5b2   :  { %v609_v17 = vsel %vm608_vm13, %v1825_v42, %v605_v10  ;;  %v264_v24 = vpop.f32.mrf.mxu1 }
 0x5b3   :  { %v614_v26 = vsel %vm611_vm14, %v613_v11, %v609_v17  ;;  %v265_v28 = vadd.f32 %v264_v24, %v2247_v9  ;;  %v717_v17 = vld [vmem:[#allocation2 + $0x58] sm:$0xff] }
 0x5b4   :  { %v617_v29 = vmul.f32 %v616_v22, %v614_v26  ;;  %v620_v39 = vsub.f32 1.0, %v614_v26  ;;  %v626_v44 = vmul.f32 %v614_v26, %v2347_v61 }
 0x5b5   :  { %283 = vst.msk [vmem:[#allocation2 + $0x78] sm:$0xff] %vm268_vm7, %v265_v28 }
 0x5b6   :  { %v618_v37 = vadd.f32 %v617_v29, %v553_v31 }
 0x5b8   :  { %1826 = vtanh.f32 %v618_v37 }
 0x5be   :  { %v1827_v38 = vpop.eup %1826 }
 0x5bf   :  { %622 = vrot.lane.b32.xlu1 %v1827_v38, %s1909_s4 }
 0x631   :  { %v623_v43 = vpop.permute.xlu1 %622 }
 0x632   :  { %v625_v25 = vmul.f32 %v623_v43, %v620_v39 }
 0x634   :  { %v627_v45 = vadd.f32 %v626_v44, %v625_v25 }
 0x636   :  { %629 = vrot.lane.b32.xlu1 %v627_v45, %s1909_s4 }
 0x6a8   :  { %v630_v46 = vpop.permute.xlu1 %629 }
 0x6a9   :  { %632 = vst.msk [vmem:[#allocation3 + $0x18] sm:$0xff] %vm160_vm1, %v630_v46  ;;  %1736 = vmatmul.msk.f32.vlgmr.msrb.gmra.mxu0 %vm268_vm7, %v630_v46  ;;  %1737 = vmatmul.msk.f32.vlgmr.msra.gmra.mxu1 %vm268_vm7, %v630_v46 }
 0x6aa   :  { %633 = vst.msk [vmem:[#allocation3 + $0x20] sm:$0xff] %vm386_vm12, %v630_v46 }
 0x726   :  { %v655_v9 = vpop.f32.mrf.mxu0  ;;  %v675_v59 = vpop.f32.mrf.mxu1 }
 0x727   :  { %v678_v7 = vadd.f32 %v655_v9, %v215_v32  ;;  %v698_v2 = vadd.f32 %v2261_v35, %v675_v59  ;;  %v799_v59 = vld [vmem:[#allocation2 + $0x68] sm:$0xff] }
 0x729   :  { %v1738_v47 = vmul.f32 -1.442695, %v678_v7 }
 0x72b   :  { %1828 = vpow2.f32 %v1738_v47 }
 0x731   :  { %v1829_v48 = vpop.eup %1828 }
 0x732   :  { %v682_v50 = vadd.f32 1.0, %v1829_v48 }
 0x734   :  { %1830 = vrcp.f32 %v682_v50  ;;  %v694_v56 = vand.u32 2147483648, %v682_v50  ;;  %v692_v58 = vand.u32 2147483647, %v682_v50  ;;  %vm688_vm2 = vweird.f32 %v682_v50 }
 0x736   :  { %v695_v62 = vor.u32 1.1754944e-38, %v694_v56  ;;  %vm693_vm4 = vcmp.eq.f32.partialorder %v692_v58, 8.507059e+37 }
 0x73a   :  { %v1831_v51 = vpop.eup %1830 }
 0x73b   :  { %v684_v52 = vmul.f32 %v1831_v51, %v682_v50  ;;  %vm689_vm15 = vweird.f32 %v1831_v51 }
 0x73c   :  { %vm690_vm3 = vmor %vm688_vm2, %vm689_vm15 }
 0x73d   :  { %v685_v55 = vsub.f32 1.0, %v684_v52 }
 0x73f   :  { %v686_v57 = vmul.f32 %v1831_v51, %v685_v55 }
 0x741   :  { %v687_v61 = vadd.f32 %v1831_v51, %v686_v57 }
 0x743   :  { %v691_v1 = vsel %vm690_vm3, %v1831_v51, %v687_v61 }
 0x744   :  { %v696_v63 = vsel %vm693_vm4, %v695_v62, %v691_v1 }
 0x745   :  { %v699_v12 = vmul.f32 %v698_v2, %v696_v63  ;;  %v702_v18 = vsub.f32 1.0, %v696_v63  ;;  %v708_v20 = vmul.f32 %v696_v63, %v627_v45 }
 0x747   :  { %v700_v14 = vadd.f32 %v699_v12, %v635_v13 }
 0x749   :  { %1832 = vtanh.f32 %v700_v14 }
 0x74f   :  { %v1833_v15 = vpop.eup %1832 }
 0x750   :  { %704 = vrot.lane.b32.xlu2 %v1833_v15, %s1909_s4 }
 0x7aa   :  { %v705_v19 = vpop.permute.xlu2 %704 }
 0x7ab   :  { %v707_v21 = vmul.f32 %v705_v19, %v702_v18 }
 0x7ad   :  { %v709_v27 = vadd.f32 %v708_v20, %v707_v21 }
 0x7af   :  { %711 = vrot.lane.b32.xlu1 %v709_v27, %s1909_s4 }
 0x821   :  { %v712_v30 = vpop.permute.xlu1 %711 }
 0x822   :  { %714 = vst.msk [vmem:[#allocation3 + $0x20] sm:$0xff] %vm160_vm1, %v712_v30  ;;  %1739 = vmatmul.msk.f32.vlgmr.msra.gmra.mxu2 %vm268_vm7, %v712_v30  ;;  %1740 = vmatmul.msk.f32.vlgmr.msrb.gmra.mxu3 %vm268_vm7, %v712_v30 }
 0x823   :  { %715 = vst.msk [vmem:[#allocation3 + $0x18] sm:$0xff] %vm386_vm12, %v712_v30 }
 0x8a5   :  { %v737_v32 = vpop.f32.mrf.mxu2  ;;  %v757_v0 = vpop.f32.mrf.mxu3 }
 0x8a6   :  { %v760_v33 = vadd.f32 %v737_v32, %v2245_v6  ;;  %v780_v6 = vadd.f32 %v2261_v35, %v757_v0 }
 0x8a8   :  { %v1741_v34 = vmul.f32 -1.442695, %v760_v33 }
 0x8aa   :  { %1834 = vpow2.f32 %v1741_v34 }
 0x8b0   :  { %v1835_v36 = vpop.eup %1834 }
 0x8b1   :  { %v764_v40 = vadd.f32 1.0, %v1835_v36 }
 0x8b3   :  { %1836 = vrcp.f32 %v764_v40  ;;  %v776_v53 = vand.u32 2147483648, %v764_v40  ;;  %v774_v3 = vand.u32 2147483647, %v764_v40  ;;  %vm770_vm6 = vweird.f32 %v764_v40 }
 0x8b5   :  { %v777_v5 = vor.u32 1.1754944e-38, %v776_v53  ;;  %vm775_vm9 = vcmp.eq.f32.partialorder %v774_v3, 8.507059e+37  ;;  %v881_v3 = vld [vmem:[#allocation2 + $0x78] sm:$0xff] }
 0x8b9   :  { %v1837_v41 = vpop.eup %1836 }
 0x8ba   :  { %v766_v42 = vmul.f32 %v1837_v41, %v764_v40  ;;  %vm771_vm5 = vweird.f32 %v1837_v41 }
 0x8bb   :  { %vm772_vm8 = vmor %vm770_vm6, %vm771_vm5 }
 0x8bc   :  { %v767_v49 = vsub.f32 1.0, %v766_v42 }
 0x8be   :  { %v768_v54 = vmul.f32 %v1837_v41, %v767_v49 }
 0x8c0   :  { %v769_v60 = vadd.f32 %v1837_v41, %v768_v54 }
 0x8c2   :  { %v773_v8 = vsel %vm772_vm8, %v1837_v41, %v769_v60 }
 0x8c3   :  { %v778_v10 = vsel %vm775_vm9, %v777_v5, %v773_v8  ;;  %v2435_v5 = vld [vmem:[%s2652_s7 + $0x18] sm:$0xff]  ;;  %v2440_v8 = vld [vmem:[%s2652_s7 + $0x10] sm:$0xff] }
 0x8c4   :  { %v781_v11 = vmul.f32 %v780_v6, %v778_v10  ;;  %v784_v26 = vsub.f32 1.0, %v778_v10  ;;  %v790_v29 = vmul.f32 %v778_v10, %v709_v27  ;;  %1078 = vmatpush.msra.mxu1 %v2435_v5  ;;  %v977_v6 = vld [vmem:[%s2653_s5 + $0x38] sm:$0xff]  ;;  %1213 = vmatpush.msra.mxu2 %v2435_v5  ;;  %v2453_v10 = vld [vmem:[%s2652_s7 + $0x8] sm:$0xff] }
 0x8c5   :  { %1014 = vmatpush.msrb.mxu0 %v977_v6  ;;  %1279 = vmatpush.msrb.mxu3 %v2435_v5 }
 0x8c6   :  { %v782_v22 = vadd.f32 %v781_v11, %v717_v17  ;;  %v976_v11 = vld [vmem:[%s2653_s5 + $0x30] sm:$0xff]  ;;  %1079 = vmatpush.msra.mxu1 %v2440_v8  ;;  %v975_v17 = vld [vmem:[%s2653_s5 + $0x28] sm:$0xff]  ;;  %1214 = vmatpush.msra.mxu2 %v2440_v8 }
 0x8c7   :  { %1015 = vmatpush.msrb.mxu0 %v976_v11  ;;  %1280 = vmatpush.msrb.mxu3 %v2440_v8 }
 0x8c8   :  { %1838 = vtanh.f32 %v782_v22  ;;  %v2467_v22 = vld [vmem:[%s2652_s7] sm:$0xff]  ;;  %1080 = vmatpush.msra.mxu1 %v2453_v10  ;;  %1215 = vmatpush.msra.mxu2 %v2453_v10 }
 0x8c9   :  { %1016 = vmatpush.msrb.mxu0 %v975_v17  ;;  %1281 = vmatpush.msrb.mxu3 %v2453_v10 }
 0x8ca   :  { %1081 = vmatpush.msra.mxu1 %v2467_v22  ;;  %1216 = vmatpush.msra.mxu2 %v2467_v22 }
 0x8cb   :  { %1282 = vmatpush.msrb.mxu3 %v2467_v22 }
 0x8ce   :  { %v1839_v24 = vpop.eup %1838 }
 0x8cf   :  { %786 = vrot.lane.b32.xlu2 %v1839_v24, %s1909_s4  ;;  %v974_v24 = vld [vmem:[%s2653_s5 + $0x20] sm:$0xff] }
 0x8d0   :  { %1017 = vmatpush.msrb.mxu0 %v974_v24 }
 0x929   :  { %v787_v28 = vpop.permute.xlu2 %786 }
 0x92a   :  { %v789_v31 = vmul.f32 %v787_v28, %v784_v26 }
 0x92c   :  { %v791_v37 = vadd.f32 %v790_v29, %v789_v31 }
 0x92e   :  { %793 = vrot.lane.b32.xlu0 %v791_v37, %s1909_s4 }
 0x9a0   :  { %v794_v38 = vpop.permute.xlu0 %793 }
 0x9a1   :  { %796 = vst.msk [vmem:[#allocation3 + $0x28] sm:$0xff] %vm160_vm1, %v794_v38  ;;  %1742 = vmatmul.msk.f32.vlgmr.msra.gmra.mxu0 %vm268_vm7, %v794_v38  ;;  %1743 = vmatmul.msk.f32.vlgmr.msrb.gmra.mxu1 %vm268_vm7, %v794_v38 }
 0x9a2   :  { %797 = vst.msk [vmem:[#allocation3 + $0x10] sm:$0xff] %vm386_vm12, %v794_v38  ;;  %1147 = vmatpush.msrb.mxu1 %v2435_v5  ;;  %v972_v38 = vld [vmem:[%s2653_s5 + $0x10] sm:$0xff] }
 0x9a4   :  { %1148 = vmatpush.msrb.mxu1 %v2440_v8 }
 0x9a6   :  { %1149 = vmatpush.msrb.mxu1 %v2453_v10 }
 0x9a8   :  { %1150 = vmatpush.msrb.mxu1 %v2467_v22 }
 0x9a9   :  { %1082 = vmatmul.f32.vlgmr.msra.gmra.mxu1 %v1908_v23 }
 0x9aa   :  { %1345 = vmatpush.msra.mxu1 %v2435_v5 }
 0x9ac   :  { %1346 = vmatpush.msra.mxu1 %v2440_v8 }
 0x9ae   :  { %1347 = vmatpush.msra.mxu1 %v2453_v10 }
 0x9b0   :  { %1348 = vmatpush.msra.mxu1 %v2467_v22 }
 0xa1e   :  { %v819_v39 = vpop.f32.mrf.mxu0  ;;  %v839_v51 = vpop.f32.mrf.mxu1 }
 0xa1f   :  { %v842_v43 = vadd.f32 %v819_v39, %v2242_v4  ;;  %v862_v4 = vadd.f32 %v2261_v35, %v839_v51  ;;  %v971_v39 = vld [vmem:[%s2653_s5 + $0x8] sm:$0xff] }
 0xa20   :  { %v967_v51 = vld [vmem:[#allocation3 + $0x28] sm:$0xff] }
 0xa21   :  { %v1744_v44 = vmul.f32 -1.442695, %v842_v43  ;;  %v970_v43 = vld [vmem:[%s2653_s5] sm:$0xff] }
 0xa23   :  { %1840 = vpow2.f32 %v1744_v44 }
 0xa29   :  { %v1841_v25 = vpop.eup %1840 }
 0xa2a   :  { %v846_v45 = vadd.f32 1.0, %v1841_v25 }
 0xa2c   :  { %1842 = vrcp.f32 %v846_v45  ;;  %v858_v47 = vand.u32 2147483648, %v846_v45  ;;  %v856_v50 = vand.u32 2147483647, %v846_v45  ;;  %vm852_vm0 = vweird.f32 %v846_v45 }
 0xa2e   :  { %v859_v55 = vor.u32 1.1754944e-38, %v858_v47  ;;  %vm857_vm13 = vcmp.eq.f32.partialorder %v856_v50, 8.507059e+37  ;;  %v966_v50 = vld [vmem:[#allocation3 + $0x20] sm:$0xff] }
 0xa32   :  { %v1843_v46 = vpop.eup %1842 }
 0xa33   :  { %v848_v9 = vmul.f32 %v1843_v46, %v846_v45  ;;  %vm853_vm10 = vweird.f32 %v1843_v46 }
 0xa34   :  { %vm854_vm11 = vmor %vm852_vm0, %vm853_vm10 }
 0xa35   :  { %v849_v7 = vsub.f32 1.0, %v848_v9 }
 0xa37   :  { %v850_v48 = vmul.f32 %v1843_v46, %v849_v7  ;;  %v964_v7 = vld [vmem:[#allocation3 + $0x10] sm:$0xff] }
 0xa39   :  { %v851_v52 = vadd.f32 %v1843_v46, %v850_v48  ;;  %v965_v48 = vld [vmem:[#allocation3 + $0x18] sm:$0xff] }
 0xa3b   :  { %v855_v56 = vsel %vm854_vm11, %v1843_v46, %v851_v52  ;;  %v1083_v46 = vpop.f32.mrf.mxu1 }
 0xa3c   :  { %v860_v57 = vsel %vm857_vm13, %v859_v55, %v855_v56  ;;  %v1800_v56 = vld [vmem:[%s2654_s6] ss:$0 sm:$0xff]  ;;  %s1910_s6 = smov 96  }
 0xa3d   :  { %v863_v58 = vmul.f32 %v862_v4, %v860_v57  ;;  %v866_v1 = vsub.f32 1.0, %v860_v57  ;;  %v872_v63 = vmul.f32 %v860_v57, %v791_v37  ;;  %v973_v37 = vld [vmem:[%s2653_s5 + $0x18] sm:$0xff] }
 0xa3e   :  { %1018 = vmatpush.msrb.mxu0 %v973_v37 }
 0xa3f   :  { %v864_v61 = vadd.f32 %v863_v58, %v799_v59 }
 0xa40   :  { %1019 = vmatpush.msrb.mxu0 %v972_v38 }
 0xa41   :  { %1844 = vtanh.f32 %v864_v61 }
 0xa42   :  { %1020 = vmatpush.msrb.mxu0 %v971_v39 }
 0xa44   :  { %1021 = vmatpush.msrb.mxu0 %v970_v43 }
 0xa47   :  { %v1845_v62 = vpop.eup %1844 }
 0xa48   :  { %868 = vrot.lane.b32.xlu1 %v1845_v62, %s1909_s4 }
 0xaba   :  { %v869_v2 = vpop.permute.xlu1 %868 }
 0xabb   :  { %v871_v12 = vmul.f32 %v869_v2, %v866_v1 }
 0xabd   :  { %v2421_v13 = vadd.f32 %v872_v63, %v871_v12 }
 0xabf   :  { %875 = vrot.lane.b32.xlu2 %v2421_v13, %s1909_s4 }
 0xb19   :  { %v876_v14 = vpop.permute.xlu2 %875 }
 0xb1a   :  { %878 = vst.msk [vmem:[#allocation3 + $0x30] sm:$0xff] %vm160_vm1, %v876_v14  ;;  %1745 = vmatmul.msk.f32.vlgmr.msrb.gmra.mxu2 %vm268_vm7, %v876_v14  ;;  %1746 = vmatmul.msk.f32.vlgmr.msra.gmra.mxu3 %vm268_vm7, %v876_v14 }
 0xb1b   :  { %879 = vst.msk [vmem:[#allocation3 + $0x8] sm:$0xff] %vm386_vm12, %v876_v14  ;;  %1411 = vmatpush.msrb.mxu2 %v2435_v5  ;;  %1477 = vmatpush.msra.mxu3 %v2435_v5 }
 0xb1d   :  { %1412 = vmatpush.msrb.mxu2 %v2440_v8  ;;  %1478 = vmatpush.msra.mxu3 %v2440_v8 }
 0xb1f   :  { %1413 = vmatpush.msrb.mxu2 %v2453_v10  ;;  %1479 = vmatpush.msra.mxu3 %v2453_v10 }
 0xb21   :  { %1414 = vmatpush.msrb.mxu2 %v2467_v22  ;;  %1480 = vmatpush.msra.mxu3 %v2467_v22  ;;  %v968_v52 = vld [vmem:[#allocation3 + $0x30] sm:$0xff] }
 0xb22   :  { %v963_v45 = vld [vmem:[#allocation3 + $0x8] sm:$0xff] }
 0xb9d   :  { %v901_v15 = vpop.f32.mrf.mxu2  ;;  %v921_v40 = vpop.f32.mrf.mxu3 }
 0xb9e   :  { %v924_v18 = vadd.f32 %v901_v15, %v2250_v16  ;;  %v944_v16 = vadd.f32 %v2261_v35, %v921_v40  ;;  %v1799_v35 = vld [vmem:[%s2651_s8] ss:$0 sm:$0xff] }
 0xb9f   :  { %1106 = vrot.lane.b32.xlu2 %v1799_v35, %s1909_s4 }
 0xba0   :  { %v1747_v19 = vmul.f32 -1.442695, %v924_v18 }
 0xba2   :  { %1846 = vpow2.f32 %v1747_v19 }
 0xba8   :  { %v1847_v20 = vpop.eup %1846 }
 0xba9   :  { %v928_v21 = vadd.f32 1.0, %v1847_v20 }
 0xbab   :  { %1848 = vrcp.f32 %v928_v21  ;;  %v940_v33 = vand.u32 2147483648, %v928_v21  ;;  %v938_v36 = vand.u32 2147483647, %v928_v21  ;;  %vm934_vm15 = vweird.f32 %v928_v21 }
 0xbad   :  { %v941_v42 = vor.u32 1.1754944e-38, %v940_v33  ;;  %vm939_vm3 = vcmp.eq.f32.partialorder %v938_v36, 8.507059e+37 }
 0xbb1   :  { %v1849_v27 = vpop.eup %1848 }
 0xbb2   :  { %v930_v30 = vmul.f32 %v1849_v27, %v928_v21  ;;  %vm935_vm14 = vweird.f32 %v1849_v27 }
 0xbb3   :  { %vm936_vm2 = vmor %vm934_vm15, %vm935_vm14 }
 0xbb4   :  { %v931_v32 = vsub.f32 1.0, %v930_v30 }
 0xbb6   :  { %v932_v34 = vmul.f32 %v1849_v27, %v931_v32 }
 0xbb8   :  { %v933_v41 = vadd.f32 %v1849_v27, %v932_v34 }
 0xbba   :  { %v937_v49 = vsel %vm936_vm2, %v1849_v27, %v933_v41 }
 0xbbb   :  { %v942_v53 = vsel %vm939_vm3, %v941_v42, %v937_v49 }
 0xbbc   :  { %v945_v54 = vmul.f32 %v944_v16, %v942_v53  ;;  %v948_v23 = vsub.f32 1.0, %v942_v53  ;;  %v954_v28 = vmul.f32 %v942_v53, %v2421_v13 }
 0xbbe   :  { %v946_v0 = vadd.f32 %v945_v54, %v881_v3 }
 0xbc0   :  { %1850 = vtanh.f32 %v946_v0 }
 0xbc6   :  { %v1851_v60 = vpop.eup %1850 }
 0xbc7   :  { %950 = vrot.lane.b32.xlu0 %v1851_v60, %s1909_s4 }
 0xbf9   :  { %v2515_v9 = vpop.permute.xlu2 %1106 }
 0xbfa   :  { %v1109_v47 = vadd.f32 %v2515_v9, %v1083_v46 }
 0xbfc   :  { %1111 = vrot.lane.b32.xlu0 %v1109_v47, %s1909_s4 }
 0xc39   :  { %v951_v26 = vpop.permute.xlu0 %950 }
 0xc3a   :  { %v953_v29 = vmul.f32 %v951_v26, %v948_v23 }
 0xc3c   :  { %v955_v31 = vadd.f32 %v954_v28, %v953_v29 }
 0xc3e   :  { %957 = vrot.lane.b32.xlu1 %v955_v31, %s1909_s4 }
 0xc6e   :  { %v1112_v40 = vpop.permute.xlu0 %1111 }
 0xcb0   :  { %v958_v44 = vpop.permute.xlu1 %957 }
 0xcb1   :  { %960 = vst.msk [vmem:[#allocation3 + $0x38] sm:$0xff] %vm160_vm1, %v958_v44 }
 0xcb2   :  { %961 = vst.msk [vmem:[#allocation3] sm:$0xff] %vm386_vm12, %v958_v44  ;;  %vm1047_vm12 = vcmask 785408  }
 0xcb8   :  { %v2524_v55 = vld [vmem:[#allocation3 + $0x38] sm:$0xff] }
 0xcb9   :  { %v962_v25 = vld [vmem:[#allocation3] sm:$0xff] }
 0xcba   :  { %1748 = vmatmul.msk.f32.vlgmr.msrb.gmra.mxu0 %vm268_vm7, %v962_v25 }
 0xcc2   :  { %1749 = vmatmul.msk.f32.gmra.mxu0 %vm268_vm7, %v963_v45 }
 0xcca   :  { %1750 = vmatmul.msk.f32.gmra.mxu0 %vm268_vm7, %v964_v7 }
 0xcd2   :  { %1751 = vmatmul.msk.f32.gmra.mxu0 %vm268_vm7, %v965_v48 }
 0xcda   :  { %1752 = vmatmul.msk.f32.gmra.mxu0 %vm268_vm7, %v966_v50 }
 0xce2   :  { %1753 = vmatmul.msk.f32.gmra.mxu0 %vm268_vm7, %v967_v51 }
 0xcea   :  { %1754 = vmatmul.msk.f32.gmra.mxu0 %vm268_vm7, %v968_v52 }
 0xcf2   :  { %1755 = vmatmul.msk.f32.gmra.mxu0 %vm268_vm7, %v2524_v55 }
 0xd37   :  { %v1023_v4 = vpop.f32.mrf.mxu0 }
 0xd38   :  { %v1024_v57 = vadd.f32 %v1800_v56, %v1023_v4 }
 0xd3a   :  { %1048 = vst.msk [vmem:[#allocation4] sm:$0xff] %vm1047_vm12, %v1024_v57 }
 0xd3f   :  { %v1026_v58 = vpop.f32.mrf.mxu0 }
 0xd40   :  { %v1027_v59 = vadd.f32 %v1800_v56, %v1026_v58 }
 0xd41   :  { %v1063_v61 = vld [vmem:[#allocation4] sm:$0xff] }
 0xd42   :  { %1049 = vst.msk [vmem:[#allocation4 + $0x8] sm:$0xff] %vm1047_vm12, %v1027_v59  ;;  %v1086_v62 = vadd.f32 %v1083_v46, %v1063_v61 }
 0xd44   :  { %v1756_v1 = vmul.f32 -1.442695, %v1086_v62 }
 0xd46   :  { %1852 = vpow2.f32 %v1756_v1 }
 0xd47   :  { %v1029_v2 = vpop.f32.mrf.mxu0 }
 0xd48   :  { %v1030_v63 = vadd.f32 %v1800_v56, %v1029_v2 }
 0xd49   :  { %v1129_v38 = vld [vmem:[#allocation4 + $0x8] sm:$0xff] }
 0xd4a   :  { %1050 = vst.msk [vmem:[#allocation4 + $0x10] sm:$0xff] %vm1047_vm12, %v1030_v63 }
 0xd4c   :  { %v1853_v12 = vpop.eup %1852 }
 0xd4d   :  { %v1090_v13 = vadd.f32 1.0, %v1853_v12 }
 0xd4f   :  { %v1032_v14 = vpop.f32.mrf.mxu0  ;;  %1854 = vrcp.f32 %v1090_v13  ;;  %v1102_v30 = vand.u32 2147483648, %v1090_v13  ;;  %v1100_v33 = vand.u32 2147483647, %v1090_v13  ;;  %vm1096_vm5 = vweird.f32 %v1090_v13 }
 0xd50   :  { %v1033_v15 = vadd.f32 %v1800_v56, %v1032_v14 }
 0xd51   :  { %v1103_v36 = vor.u32 1.1754944e-38, %v1102_v30  ;;  %vm1101_vm8 = vcmp.eq.f32.partialorder %v1100_v33, 8.507059e+37 }
 0xd52   :  { %1051 = vst.msk [vmem:[#allocation4 + $0x18] sm:$0xff] %vm1047_vm12, %v1033_v15 }
 0xd55   :  { %v1855_v18 = vpop.eup %1854 }
 0xd56   :  { %v1092_v19 = vmul.f32 %v1855_v18, %v1090_v13  ;;  %vm1097_vm4 = vweird.f32 %v1855_v18  ;;  %v1195_v13 = vld [vmem:[#allocation4 + $0x10] sm:$0xff] }
 0xd57   :  { %v1035_v20 = vpop.f32.mrf.mxu0  ;;  %vm1098_vm6 = vmor %vm1096_vm5, %vm1097_vm4 }
 0xd58   :  { %v1036_v21 = vadd.f32 %v1800_v56, %v1035_v20  ;;  %v1093_v27 = vsub.f32 1.0, %v1092_v19 }
 0xd5a   :  { %1052 = vst.msk [vmem:[#allocation4 + $0x20] sm:$0xff] %vm1047_vm12, %v1036_v21  ;;  %v1094_v32 = vmul.f32 %v1855_v18, %v1093_v27 }
 0xd5c   :  { %v1095_v34 = vadd.f32 %v1855_v18, %v1094_v32 }
 0xd5e   :  { %v1099_v41 = vsel %vm1098_vm6, %v1855_v18, %v1095_v34 }
 0xd5f   :  { %v1104_v42 = vsel %vm1101_vm8, %v1103_v36, %v1099_v41  ;;  %v1038_v49 = vpop.f32.mrf.mxu0 }
 0xd60   :  { %v1114_v16 = vmul.f32 %v1112_v40, %v1104_v42  ;;  %v1039_v53 = vadd.f32 %v1800_v56, %v1038_v49  ;;  %v1121_v17 = vsub.f32 1.0, %v1104_v42  ;;  %v1127_v23 = vmul.f32 0.0, %v1104_v42 }
 0xd62   :  { %1053 = vst.msk [vmem:[#allocation4 + $0x28] sm:$0xff] %vm1047_vm12, %v1039_v53  ;;  %1116 = vrot.lane.b32.xlu1 %v1114_v16, %s1909_s4 }
 0xd67   :  { %v1041_v54 = vpop.f32.mrf.mxu0 }
 0xd68   :  { %v1042_v3 = vadd.f32 %v1800_v56, %v1041_v54 }
 0xd6a   :  { %1054 = vst.msk [vmem:[#allocation4 + $0x30] sm:$0xff] %vm1047_vm12, %v1042_v3 }
 0xd6f   :  { %v1044_v0 = vpop.f32.mrf.mxu0 }
 0xd70   :  { %v1045_v60 = vadd.f32 %v1800_v56, %v1044_v0 }
 0xd72   :  { %1055 = vst.msk [vmem:[#allocation4 + $0x38] sm:$0xff] %vm1047_vm12, %v1045_v60 }
 0xdd4   :  { %v1117_v35 = vpop.permute.xlu1 %1116 }
 0xdd5   :  { %v1119_v6 = vadd.f32 %v1117_v35, %v1063_v61 }
 0xdd7   :  { %1856 = vtanh.f32 %v1119_v6 }
 0xddd   :  { %v1857_v11 = vpop.eup %1856 }
 0xdde   :  { %1123 = vrot.lane.b32.xlu2 %v1857_v11, %s1910_s6 }
 0xe38   :  { %v1124_v24 = vpop.permute.xlu2 %1123 }
 0xe39   :  { %v1126_v26 = vmul.f32 %v1124_v24, %v1121_v17 }
 0xe3b   :  { %v1128_v28 = vadd.f32 %v1127_v23, %v1126_v26  ;;  %v1261_v23 = vld [vmem:[#allocation4 + $0x18] sm:$0xff] }
 0xe3d   :  { %1131 = vrot.lane.b32.xlu0 %v1128_v28, %s1910_s6 }
 0xeaf   :  { %v1132_v29 = vpop.permute.xlu0 %1131 }
 0xeb0   :  { %1757 = vmatmul.msk.f32.vlgmr.msrb.gmra.mxu1 %vm160_vm1, %v1132_v29 }
 0xeb1   :  { %1543 = vmatpush.msrb.mxu1 %v2435_v5 }
 0xeb3   :  { %1544 = vmatpush.msrb.mxu1 %v2440_v8 }
 0xeb5   :  { %1545 = vmatpush.msrb.mxu1 %v2453_v10 }
 0xeb7   :  { %1546 = vmatpush.msrb.mxu1 %v2467_v22 }
 0xf2d   :  { %v1152_v31 = vpop.f32.mrf.mxu1 }
 0xf2e   :  { %v1175_v37 = vadd.f32 %v1152_v31, %v2515_v9  ;;  %v1155_v39 = vadd.f32 %v1152_v31, %v1129_v38 }
 0xf30   :  { %1177 = vrot.lane.b32.xlu1 %v1175_v37, %s1909_s4  ;;  %v1758_v43 = vmul.f32 -1.442695, %v1155_v39 }
 0xf32   :  { %1858 = vpow2.f32 %v1758_v43 }
 0xf38   :  { %v1859_v44 = vpop.eup %1858 }
 0xf39   :  { %v1159_v25 = vadd.f32 1.0, %v1859_v44 }
 0xf3b   :  { %1860 = vrcp.f32 %v1159_v25  ;;  %v1171_v10 = vand.u32 2147483648, %v1159_v25  ;;  %vm1165_vm10 = vweird.f32 %v1159_v25  ;;  %v1169_v22 = vand.u32 2147483647, %v1159_v25 }
 0xf3d   :  { %v1172_v48 = vor.u32 1.1754944e-38, %v1171_v10  ;;  %vm1170_vm11 = vcmp.eq.f32.partialorder %v1169_v22, 8.507059e+37 }
 0xf41   :  { %v1861_v45 = vpop.eup %1860 }
 0xf42   :  { %v1161_v5 = vmul.f32 %v1861_v45, %v1159_v25  ;;  %vm1166_vm9 = vweird.f32 %v1861_v45 }
 0xf43   :  { %vm1167_vm0 = vmor %vm1165_vm10, %vm1166_vm9 }
 0xf44   :  { %v1162_v46 = vsub.f32 1.0, %v1161_v5 }
 0xf46   :  { %v1163_v8 = vmul.f32 %v1861_v45, %v1162_v46 }
 0xf48   :  { %v1164_v7 = vadd.f32 %v1861_v45, %v1163_v8 }
 0xf4a   :  { %v1168_v47 = vsel %vm1167_vm0, %v1861_v45, %v1164_v7 }
 0xf4b   :  { %v1173_v51 = vsel %vm1170_vm11, %v1172_v48, %v1168_v47 }
 0xf4c   :  { %v1187_v58 = vsub.f32 1.0, %v1173_v51  ;;  %v1193_v61 = vmul.f32 %v1173_v51, %v1128_v28 }
 0xfa2   :  { %v1178_v50 = vpop.permute.xlu1 %1177 }
 0xfa3   :  { %v1180_v52 = vmul.f32 %v1178_v50, %v1173_v51 }
 0xfa5   :  { %1182 = vrot.lane.b32.xlu2 %v1180_v52, %s1909_s4 }
 0xfff   :  { %v1183_v56 = vpop.permute.xlu2 %1182 }
0x1000   :  { %v1185_v4 = vadd.f32 %v1183_v56, %v1129_v38 }
0x1002   :  { %1862 = vtanh.f32 %v1185_v4 }
0x1008   :  { %v1863_v57 = vpop.eup %1862 }
0x1009   :  { %1189 = vrot.lane.b32.xlu0 %v1863_v57, %s1910_s6 }
0x107b   :  { %v1190_v59 = vpop.permute.xlu0 %1189 }
0x107c   :  { %v1192_v62 = vmul.f32 %v1190_v59, %v1187_v58 }
0x107e   :  { %v1194_v1 = vadd.f32 %v1193_v61, %v1192_v62  ;;  %v1327_v61 = vld [vmem:[#allocation4 + $0x20] sm:$0xff] }
0x1080   :  { %1197 = vrot.lane.b32.xlu1 %v1194_v1, %s1910_s6 }
0x10f2   :  { %v1198_v2 = vpop.permute.xlu1 %1197 }
0x10f3   :  { %1759 = vmatmul.msk.f32.vlgmr.msra.gmra.mxu2 %vm160_vm1, %v1198_v2 }
0x1176   :  { %v1218_v63 = vpop.f32.mrf.mxu2 }
0x1177   :  { %v1241_v12 = vadd.f32 %v1218_v63, %v2515_v9  ;;  %v1221_v14 = vadd.f32 %v1218_v63, %v1195_v13 }
0x1179   :  { %1243 = vrot.lane.b32.xlu2 %v1241_v12, %s1909_s4  ;;  %v1760_v15 = vmul.f32 -1.442695, %v1221_v14 }
0x117b   :  { %1864 = vpow2.f32 %v1760_v15 }
0x1181   :  { %v1865_v18 = vpop.eup %1864 }
0x1182   :  { %v1225_v19 = vadd.f32 1.0, %v1865_v18 }
0x1184   :  { %1866 = vrcp.f32 %v1225_v19  ;;  %v1237_v33 = vand.u32 2147483648, %v1225_v19  ;;  %vm1231_vm14 = vweird.f32 %v1225_v19  ;;  %v1235_v34 = vand.u32 2147483647, %v1225_v19 }
0x1186   :  { %v1238_v40 = vor.u32 1.1754944e-38, %v1237_v33  ;;  %vm1236_vm2 = vcmp.eq.f32.partialorder %v1235_v34, 8.507059e+37 }
0x118a   :  { %v1867_v20 = vpop.eup %1866 }
0x118b   :  { %v1227_v21 = vmul.f32 %v1867_v20, %v1225_v19  ;;  %vm1232_vm13 = vweird.f32 %v1867_v20 }
0x118c   :  { %vm1233_vm15 = vmor %vm1231_vm14, %vm1232_vm13 }
0x118d   :  { %v1228_v27 = vsub.f32 1.0, %v1227_v21 }
0x118f   :  { %v1229_v30 = vmul.f32 %v1867_v20, %v1228_v27 }
0x1191   :  { %v1230_v32 = vadd.f32 %v1867_v20, %v1229_v30 }
0x1193   :  { %v1234_v36 = vsel %vm1233_vm15, %v1867_v20, %v1230_v32 }
0x1194   :  { %v1239_v42 = vsel %vm1236_vm2, %v1238_v40, %v1234_v36 }
0x1195   :  { %v1253_v3 = vsub.f32 1.0, %v1239_v42  ;;  %v1259_v60 = vmul.f32 %v1239_v42, %v1194_v1 }
0x11d3   :  { %v1244_v41 = vpop.permute.xlu2 %1243 }
0x11d4   :  { %v1246_v49 = vmul.f32 %v1244_v41, %v1239_v42  ;;  %v1599_v41 = vld [vmem:[%s2655_s9 + $0x38] sm:$0xff]  ;;  %v1598_v42 = vld [vmem:[%s2655_s9 + $0x30] sm:$0xff] }
0x11d5   :  { %1615 = vmatpush.msra.mxu2 %v1599_v41 }
0x11d6   :  { %1248 = vrot.lane.b32.xlu0 %v1246_v49, %s1909_s4  ;;  %v1597_v49 = vld [vmem:[%s2655_s9 + $0x28] sm:$0xff] }
0x11d7   :  { %1616 = vmatpush.msra.mxu2 %v1598_v42  ;;  %v1801_v42 = vld [vmem:[%s2656_s10] ss:$0 sm:$0xff] }
0x11d9   :  { %1617 = vmatpush.msra.mxu2 %v1597_v49 }
0x1248   :  { %v1249_v16 = vpop.permute.xlu0 %1248 }
0x1249   :  { %v1251_v53 = vadd.f32 %v1249_v16, %v1195_v13  ;;  %v1596_v16 = vld [vmem:[%s2655_s9 + $0x20] sm:$0xff] }
0x124a   :  { %1618 = vmatpush.msra.mxu2 %v1596_v16 }
0x124b   :  { %1868 = vtanh.f32 %v1251_v53 }
0x1251   :  { %v1869_v54 = vpop.eup %1868 }
0x1252   :  { %1255 = vrot.lane.b32.xlu1 %v1869_v54, %s1910_s6 }
0x12c4   :  { %v1256_v0 = vpop.permute.xlu1 %1255 }
0x12c5   :  { %v1258_v35 = vmul.f32 %v1256_v0, %v1253_v3 }
0x12c7   :  { %v1260_v6 = vadd.f32 %v1259_v60, %v1258_v35  ;;  %v1595_v35 = vld [vmem:[%s2655_s9 + $0x18] sm:$0xff] }
0x12c8   :  { %1619 = vmatpush.msra.mxu2 %v1595_v35 }
0x12c9   :  { %1263 = vrot.lane.b32.xlu2 %v1260_v6, %s1910_s6 }
0x1323   :  { %v1264_v11 = vpop.permute.xlu2 %1263 }
0x1324   :  { %1761 = vmatmul.msk.f32.vlgmr.msrb.gmra.mxu3 %vm160_vm1, %v1264_v11  ;;  %v1593_v11 = vld [vmem:[%s2655_s9 + $0x8] sm:$0xff] }
0x13a7   :  { %v1284_v17 = vpop.f32.mrf.mxu3 }
0x13a8   :  { %v1307_v24 = vadd.f32 %v1284_v17, %v2515_v9  ;;  %v1287_v26 = vadd.f32 %v1284_v17, %v1261_v23  ;;  %v1592_v17 = vld [vmem:[%s2655_s9] sm:$0xff] }
0x13aa   :  { %1309 = vrot.lane.b32.xlu0 %v1307_v24, %s1909_s4  ;;  %v1762_v28 = vmul.f32 -1.442695, %v1287_v26 }
0x13ac   :  { %1870 = vpow2.f32 %v1762_v28  ;;  %v1393_v28 = vld [vmem:[#allocation4 + $0x28] sm:$0xff] }
0x13b2   :  { %v1871_v29 = vpop.eup %1870 }
0x13b3   :  { %v1291_v31 = vadd.f32 1.0, %v1871_v29 }
0x13b5   :  { %1872 = vrcp.f32 %v1291_v31  ;;  %v1303_v25 = vand.u32 2147483648, %v1291_v31  ;;  %vm1297_vm12 = vweird.f32 %v1291_v31  ;;  %v1301_v45 = vand.u32 2147483647, %v1291_v31 }
0x13b7   :  { %v1304_v46 = vor.u32 1.1754944e-38, %v1303_v25  ;;  %vm1302_vm5 = vcmp.eq.f32.partialorder %v1301_v45, 8.507059e+37 }
0x13bb   :  { %v1873_v37 = vpop.eup %1872 }
0x13bc   :  { %v1293_v38 = vmul.f32 %v1873_v37, %v1291_v31  ;;  %vm1298_vm3 = vweird.f32 %v1873_v37 }
0x13bd   :  { %vm1299_vm4 = vmor %vm1297_vm12, %vm1298_vm3 }
0x13be   :  { %v1294_v39 = vsub.f32 1.0, %v1293_v38 }
0x13c0   :  { %v1295_v43 = vmul.f32 %v1873_v37, %v1294_v39 }
0x13c2   :  { %v1296_v44 = vadd.f32 %v1873_v37, %v1295_v43 }
0x13c4   :  { %v1300_v5 = vsel %vm1299_vm4, %v1873_v37, %v1296_v44 }
0x13c5   :  { %v1305_v7 = vsel %vm1302_vm5, %v1304_v46, %v1300_v5 }
0x13c6   :  { %v1319_v50 = vsub.f32 1.0, %v1305_v7  ;;  %v1325_v52 = vmul.f32 %v1305_v7, %v1260_v6  ;;  %v1594_v6 = vld [vmem:[%s2655_s9 + $0x10] sm:$0xff] }
0x13c7   :  { %1620 = vmatpush.msra.mxu2 %v1594_v6 }
0x13c9   :  { %1621 = vmatpush.msra.mxu2 %v1593_v11 }
0x13cb   :  { %1622 = vmatpush.msra.mxu2 %v1592_v17 }
0x141c   :  { %v1310_v8 = vpop.permute.xlu0 %1309 }
0x141d   :  { %v1312_v10 = vmul.f32 %v1310_v8, %v1305_v7 }
0x141f   :  { %1314 = vrot.lane.b32.xlu1 %v1312_v10, %s1909_s4 }
0x1491   :  { %v1315_v22 = vpop.permute.xlu1 %1314 }
0x1492   :  { %v1317_v47 = vadd.f32 %v1315_v22, %v1261_v23 }
0x1494   :  { %1874 = vtanh.f32 %v1317_v47 }
0x149a   :  { %v1875_v48 = vpop.eup %1874 }
0x149b   :  { %1321 = vrot.lane.b32.xlu2 %v1875_v48, %s1910_s6 }
0x14f5   :  { %v1322_v51 = vpop.permute.xlu2 %1321 }
0x14f6   :  { %v1324_v56 = vmul.f32 %v1322_v51, %v1319_v50 }
0x14f8   :  { %v1326_v4 = vadd.f32 %v1325_v52, %v1324_v56 }
0x14fa   :  { %1329 = vrot.lane.b32.xlu0 %v1326_v4, %s1910_s6 }
0x156c   :  { %v1330_v57 = vpop.permute.xlu0 %1329 }
0x156d   :  { %1763 = vmatmul.msk.f32.vlgmr.msra.gmra.mxu1 %vm160_vm1, %v1330_v57 }
0x15ea   :  { %v1350_v58 = vpop.f32.mrf.mxu1 }
0x15eb   :  { %v1373_v59 = vadd.f32 %v1350_v58, %v2515_v9  ;;  %v1353_v62 = vadd.f32 %v1350_v58, %v1327_v61 }
0x15ed   :  { %1375 = vrot.lane.b32.xlu1 %v1373_v59, %s1909_s4  ;;  %v1764_v1 = vmul.f32 -1.442695, %v1353_v62  ;;  %v1459_v62 = vld [vmem:[#allocation4 + $0x30] sm:$0xff] }
0x15ef   :  { %1876 = vpow2.f32 %v1764_v1 }
0x15f5   :  { %v1877_v2 = vpop.eup %1876 }
0x15f6   :  { %v1357_v63 = vadd.f32 1.0, %v1877_v2 }
0x15f8   :  { %1878 = vrcp.f32 %v1357_v63  ;;  %v1369_v19 = vand.u32 2147483648, %v1357_v63  ;;  %vm1363_vm8 = vweird.f32 %v1357_v63  ;;  %v1367_v20 = vand.u32 2147483647, %v1357_v63 }
0x15fa   :  { %v1370_v27 = vor.u32 1.1754944e-38, %v1369_v19  ;;  %vm1368_vm10 = vcmp.eq.f32.partialorder %v1367_v20, 8.507059e+37 }
0x15fe   :  { %v1879_v12 = vpop.eup %1878 }
0x15ff   :  { %v1359_v13 = vmul.f32 %v1879_v12, %v1357_v63  ;;  %vm1364_vm6 = vweird.f32 %v1879_v12 }
0x1600   :  { %vm1365_vm9 = vmor %vm1363_vm8, %vm1364_vm6 }
0x1601   :  { %v1360_v14 = vsub.f32 1.0, %v1359_v13 }
0x1603   :  { %v1361_v15 = vmul.f32 %v1879_v12, %v1360_v14 }
0x1605   :  { %v1362_v18 = vadd.f32 %v1879_v12, %v1361_v15 }
0x1607   :  { %v1366_v21 = vsel %vm1365_vm9, %v1879_v12, %v1362_v18 }
0x1608   :  { %v1371_v32 = vsel %vm1368_vm10, %v1370_v27, %v1366_v21 }
0x1609   :  { %v1385_v53 = vsub.f32 1.0, %v1371_v32  ;;  %v1391_v3 = vmul.f32 %v1371_v32, %v1326_v4 }
0x165f   :  { %v1376_v30 = vpop.permute.xlu1 %1375 }
0x1660   :  { %v1378_v33 = vmul.f32 %v1376_v30, %v1371_v32 }
0x1662   :  { %1380 = vrot.lane.b32.xlu2 %v1378_v33, %s1909_s4 }
0x16bc   :  { %v1381_v34 = vpop.permute.xlu2 %1380 }
0x16bd   :  { %v1383_v36 = vadd.f32 %v1381_v34, %v1327_v61 }
0x16bf   :  { %1880 = vtanh.f32 %v1383_v36 }
0x16c5   :  { %v1881_v40 = vpop.eup %1880 }
0x16c6   :  { %1387 = vrot.lane.b32.xlu0 %v1881_v40, %s1910_s6 }
0x1738   :  { %v1388_v54 = vpop.permute.xlu0 %1387 }
0x1739   :  { %v1390_v0 = vmul.f32 %v1388_v54, %v1385_v53 }
0x173b   :  { %v1392_v60 = vadd.f32 %v1391_v3, %v1390_v0 }
0x173d   :  { %1395 = vrot.lane.b32.xlu1 %v1392_v60, %s1910_s6 }
0x17af   :  { %v1396_v24 = vpop.permute.xlu1 %1395 }
0x17b0   :  { %1765 = vmatmul.msk.f32.vlgmr.msrb.gmra.mxu2 %vm160_vm1, %v1396_v24 }
0x17b8   :  { %1771 = vmatmul.msk.f32.vlgmr.msra.gmra.mxu2 %vm268_vm7, %v2524_v55 }
0x1833   :  { %v1416_v23 = vpop.f32.mrf.mxu2 }
0x1834   :  { %v1439_v26 = vadd.f32 %v1416_v23, %v2515_v9  ;;  %v1419_v29 = vadd.f32 %v1416_v23, %v1393_v28 }
0x1836   :  { %1441 = vrot.lane.b32.xlu2 %v1439_v26, %s1909_s4  ;;  %v1766_v31 = vmul.f32 -1.442695, %v1419_v29 }
0x1838   :  { %1882 = vpow2.f32 %v1766_v31 }
0x183b   :  { %v1624_v49 = vpop.f32.mrf.mxu2 }
0x183c   :  { %v1625_v16 = vadd.f32 %v1801_v42, %v1624_v49 }
0x183e   :  { %v1883_v37 = vpop.eup %1882  ;;  %v1772_v53 = vmul.f32 -1.442695, %v1625_v16 }
0x183f   :  { %v1423_v38 = vadd.f32 1.0, %v1883_v37 }
0x1841   :  { %1884 = vrcp.f32 %v1423_v38  ;;  %v1435_v5 = vand.u32 2147483648, %v1423_v38  ;;  %vm1429_vm7 = vweird.f32 %v1423_v38  ;;  %v1433_v55 = vand.u32 2147483647, %v1423_v38 }
0x1843   :  { %v1436_v8 = vor.u32 1.1754944e-38, %v1435_v5  ;;  %vm1434_vm13 = vcmp.eq.f32.partialorder %v1433_v55, 8.507059e+37  ;;  %v1525_v55 = vld [vmem:[#allocation4 + $0x38] sm:$0xff] }
0x1847   :  { %v1885_v39 = vpop.eup %1884 }
0x1848   :  { %v1425_v43 = vmul.f32 %v1885_v39, %v1423_v38  ;;  %vm1430_vm0 = vweird.f32 %v1885_v39 }
0x1849   :  { %vm1431_vm11 = vmor %vm1429_vm7, %vm1430_vm0 }
0x184a   :  { %v1426_v44 = vsub.f32 1.0, %v1425_v43 }
0x184c   :  { %v1427_v25 = vmul.f32 %v1885_v39, %v1426_v44 }
0x184e   :  { %v1428_v45 = vadd.f32 %v1885_v39, %v1427_v25 }
0x1850   :  { %v1432_v46 = vsel %vm1431_vm11, %v1885_v39, %v1428_v45  ;;  %v1802_v39 = vld [vmem:[%s2657_s11] ss:$0 sm:$0xff] }
0x1851   :  { %v1437_v10 = vsel %vm1434_vm13, %v1436_v8, %v1432_v46 }
0x1852   :  { %v1451_v51 = vsub.f32 1.0, %v1437_v10  ;;  %v1457_v56 = vmul.f32 %v1437_v10, %v1392_v60 }
0x1890   :  { %v1442_v7 = vpop.permute.xlu2 %1441 }
0x1891   :  { %v1444_v22 = vmul.f32 %v1442_v7, %v1437_v10 }
0x1893   :  { %1446 = vrot.lane.b32.xlu0 %v1444_v22, %s1909_s4 }
0x1905   :  { %v1447_v47 = vpop.permute.xlu0 %1446 }
0x1906   :  { %v1449_v48 = vadd.f32 %v1447_v47, %v1393_v28 }
0x1908   :  { %1886 = vtanh.f32 %v1449_v48 }
0x190e   :  { %v1887_v50 = vpop.eup %1886 }
0x190f   :  { %1453 = vrot.lane.b32.xlu1 %v1887_v50, %s1910_s6 }
0x1981   :  { %v1454_v52 = vpop.permute.xlu1 %1453 }
0x1982   :  { %v1456_v4 = vmul.f32 %v1454_v52, %v1451_v51 }
0x1984   :  { %v1458_v57 = vadd.f32 %v1457_v56, %v1456_v4 }
0x1986   :  { %1461 = vrot.lane.b32.xlu2 %v1458_v57, %s1910_s6 }
0x19e0   :  { %v1462_v58 = vpop.permute.xlu2 %1461 }
0x19e1   :  { %1767 = vmatmul.msk.f32.vlgmr.msra.gmra.mxu3 %vm160_vm1, %v1462_v58 }
0x1a64   :  { %v1482_v59 = vpop.f32.mrf.mxu3 }
0x1a65   :  { %v1505_v61 = vadd.f32 %v1482_v59, %v2515_v9  ;;  %v1485_v1 = vadd.f32 %v1482_v59, %v1459_v62 }
0x1a67   :  { %1507 = vrot.lane.b32.xlu0 %v1505_v61, %s1909_s4  ;;  %v1768_v2 = vmul.f32 -1.442695, %v1485_v1 }
0x1a69   :  { %1888 = vpow2.f32 %v1768_v2 }
0x1a6f   :  { %v1889_v63 = vpop.eup %1888 }
0x1a70   :  { %v1489_v12 = vadd.f32 1.0, %v1889_v63 }
0x1a72   :  { %1890 = vrcp.f32 %v1489_v12  ;;  %v1501_v20 = vand.u32 2147483648, %v1489_v12  ;;  %vm1495_vm15 = vweird.f32 %v1489_v12  ;;  %v1499_v21 = vand.u32 2147483647, %v1489_v12 }
0x1a74   :  { %v1502_v30 = vor.u32 1.1754944e-38, %v1501_v20  ;;  %vm1500_vm3 = vcmp.eq.f32.partialorder %v1499_v21, 8.507059e+37 }
0x1a78   :  { %v1891_v13 = vpop.eup %1890 }
0x1a79   :  { %v1491_v14 = vmul.f32 %v1891_v13, %v1489_v12  ;;  %vm1496_vm14 = vweird.f32 %v1891_v13 }
0x1a7a   :  { %vm1497_vm2 = vmor %vm1495_vm15, %vm1496_vm14 }
0x1a7b   :  { %v1492_v15 = vsub.f32 1.0, %v1491_v14  ;;  %v1666_v14 = vld [vmem:[%s2658_s12 + $0x10] sm:$0xff] }
0x1a7d   :  { %v1493_v18 = vmul.f32 %v1891_v13, %v1492_v15  ;;  %v1665_v15 = vld [vmem:[%s2658_s12 + $0x8] sm:$0xff] }
0x1a7f   :  { %v1494_v19 = vadd.f32 %v1891_v13, %v1493_v18  ;;  %v1664_v18 = vld [vmem:[%s2658_s12] sm:$0xff] }
0x1a81   :  { %v1498_v27 = vsel %vm1497_vm2, %v1891_v13, %v1494_v19  ;;  %v1667_v13 = vld [vmem:[%s2658_s12 + $0x18] sm:$0xff] }
0x1a82   :  { %v1503_v33 = vsel %vm1500_vm3, %v1502_v30, %v1498_v27  ;;  %1689 = vmatpush.msrb.mxu3 %v1667_v13 }
0x1a83   :  { %v1517_v11 = vsub.f32 1.0, %v1503_v33  ;;  %v1523_v24 = vmul.f32 %v1503_v33, %v1458_v57 }
0x1a84   :  { %1690 = vmatpush.msrb.mxu3 %v1666_v14 }
0x1a86   :  { %1691 = vmatpush.msrb.mxu3 %v1665_v15 }
0x1a88   :  { %1692 = vmatpush.msrb.mxu3 %v1664_v18 }
0x1ad9   :  { %v1508_v32 = vpop.permute.xlu0 %1507 }
0x1ada   :  { %v1510_v34 = vmul.f32 %v1508_v32, %v1503_v33 }
0x1adc   :  { %1512 = vrot.lane.b32.xlu1 %v1510_v34, %s1909_s4 }
0x1b4e   :  { %v1513_v36 = vpop.permute.xlu1 %1512 }
0x1b4f   :  { %v1515_v40 = vadd.f32 %v1513_v36, %v1459_v62 }
0x1b51   :  { %1892 = vtanh.f32 %v1515_v40 }
0x1b52   :  { %1894 = vpow2.f32 %v1772_v53 }
0x1b57   :  { %v1893_v41 = vpop.eup %1892 }
0x1b58   :  { %1519 = vrot.lane.b32.xlu2 %v1893_v41, %s1910_s6  ;;  %v1895_v54 = vpop.eup %1894  ;;  %v1803_v41 = vld [vmem:[%s2659_s13] ss:$0 sm:$0xff] }
0x1b59   :  { %v1630_v3 = vadd.f32 1.0, %v1895_v54 }
0x1b5b   :  { %1896 = vrcp.f32 %v1630_v3  ;;  %v1642_v28 = vand.u32 2147483648, %v1630_v3  ;;  %vm1636_vm4 = vweird.f32 %v1630_v3  ;;  %v1640_v31 = vand.u32 2147483647, %v1630_v3 }
0x1b5d   :  { %v1643_v38 = vor.u32 1.1754944e-38, %v1642_v28  ;;  %vm1641_vm6 = vcmp.eq.f32.partialorder %v1640_v31, 8.507059e+37 }
0x1b61   :  { %v1897_v0 = vpop.eup %1896 }
0x1b62   :  { %v1632_v60 = vmul.f32 %v1897_v0, %v1630_v3  ;;  %vm1637_vm12 = vweird.f32 %v1897_v0 }
0x1b63   :  { %vm1638_vm5 = vmor %vm1636_vm4, %vm1637_vm12 }
0x1b64   :  { %v1633_v35 = vsub.f32 1.0, %v1632_v60 }
0x1b66   :  { %v1634_v6 = vmul.f32 %v1897_v0, %v1633_v35 }
0x1b68   :  { %v1635_v26 = vadd.f32 %v1897_v0, %v1634_v6 }
0x1b6a   :  { %v1639_v37 = vsel %vm1638_vm5, %v1897_v0, %v1635_v26 }
0x1b6b   :  { %v1644_v43 = vsel %vm1641_vm6, %v1643_v38, %v1639_v37 }
0x1b6c   :  { %v1650_v44 = vmul.f32 %v1802_v39, %v1644_v43  ;;  %v1657_v27 = vsub.f32 1.0, %v1644_v43 }
0x1bb2   :  { %v1520_v17 = vpop.permute.xlu2 %1519 }
0x1bb3   :  { %v1522_v23 = vmul.f32 %v1520_v17, %v1517_v11 }
0x1bb5   :  { %v2610_v29 = vadd.f32 %v1523_v24, %v1522_v23 }
0x1bb7   :  { %1527 = vrot.lane.b32.xlu0 %v2610_v29, %s1910_s6 }
0x1bbf   :  { %1652 = vrot.lane.b32.xlu0 %v1650_v44, %s1909_s4 }
0x1c29   :  { %v1528_v25 = vpop.permute.xlu0 %1527 }
0x1c2a   :  { %1769 = vmatmul.msk.f32.vlgmr.msrb.gmra.mxu1 %vm160_vm1, %v1528_v25 }
0x1ca7   :  { %v1548_v45 = vpop.f32.mrf.mxu1 }
0x1ca8   :  { %v1571_v5 = vadd.f32 %v1548_v45, %v2515_v9  ;;  %v1551_v46 = vadd.f32 %v1548_v45, %v1525_v55  ;;  %v1653_v9 = vpop.permute.xlu0 %1652 }
0x1ca9   :  { %v1655_v58 = vadd.f32 %v1653_v9, %v1625_v16 }
0x1caa   :  { %1573 = vrot.lane.b32.xlu1 %v1571_v5, %s1909_s4  ;;  %v1770_v8 = vmul.f32 -1.442695, %v1551_v46 }
0x1cac   :  { %1898 = vpow2.f32 %v1770_v8 }
0x1cb2   :  { %v1899_v7 = vpop.eup %1898 }
0x1cb3   :  { %v1555_v10 = vadd.f32 1.0, %v1899_v7 }
0x1cb5   :  { %1900 = vrcp.f32 %v1555_v10  ;;  %v1567_v52 = vand.u32 2147483648, %v1555_v10  ;;  %vm1561_vm9 = vweird.f32 %v1555_v10  ;;  %v1565_v56 = vand.u32 2147483647, %v1555_v10 }
0x1cb6   :  { %1902 = vtanh.f32 %v1655_v58 }
0x1cb7   :  { %v1568_v57 = vor.u32 1.1754944e-38, %v1567_v52  ;;  %vm1566_vm0 = vcmp.eq.f32.partialorder %v1565_v56, 8.507059e+37 }
0x1cbb   :  { %v1901_v22 = vpop.eup %1900 }
0x1cbc   :  { %v1557_v47 = vmul.f32 %v1901_v22, %v1555_v10  ;;  %vm1562_vm8 = vweird.f32 %v1901_v22  ;;  %v1903_v1 = vpop.eup %1902 }
0x1cbd   :  { %vm1563_vm10 = vmor %vm1561_vm9, %vm1562_vm8 }
0x1cbe   :  { %v1558_v48 = vsub.f32 1.0, %v1557_v47 }
0x1cc0   :  { %v1559_v50 = vmul.f32 %v1901_v22, %v1558_v48 }
0x1cc2   :  { %v1560_v51 = vadd.f32 %v1901_v22, %v1559_v50 }
0x1cc4   :  { %v1564_v4 = vsel %vm1563_vm10, %v1901_v22, %v1560_v51 }
0x1cc5   :  { %v1569_v61 = vsel %vm1566_vm0, %v1568_v57, %v1564_v4 }
0x1cc6   :  { %v1583_v19 = vsub.f32 1.0, %v1569_v61  ;;  %v1589_v30 = vmul.f32 %v1569_v61, %v2610_v29 }
0x1d1c   :  { %v1574_v59 = vpop.permute.xlu1 %1573 }
0x1d1d   :  { %v1576_v62 = vmul.f32 %v1574_v59, %v1569_v61 }
0x1d1f   :  { %1578 = vrot.lane.b32.xlu2 %v1576_v62, %s1909_s4 }
0x1d27   :  { %1659 = vrot.lane.b32.xlu2 %v1903_v1, %s1910_s6 }
0x1d79   :  { %v1579_v2 = vpop.permute.xlu2 %1578 }
0x1d7a   :  { %v1581_v63 = vadd.f32 %v1579_v2, %v1525_v55 }
0x1d7c   :  { %1904 = vtanh.f32 %v1581_v63 }
0x1d81   :  { %v1660_v20 = vpop.permute.xlu2 %1659 }
0x1d82   :  { %v1905_v12 = vpop.eup %1904  ;;  %v1662_v33 = vmul.f32 %v1660_v20, %v1657_v27 }
0x1d83   :  { %1585 = vrot.lane.b32.xlu1 %v1905_v12, %s1910_s6 }
0x1df5   :  { %v1586_v21 = vpop.permute.xlu1 %1585 }
0x1df6   :  { %v1588_v32 = vmul.f32 %v1586_v21, %v1583_v19 }
0x1df8   :  { %v1590_v34 = vadd.f32 %v1589_v30, %v1588_v32 }
0x1dfa   :  { %v1663_v36 = vadd.f32 %v1662_v33, %v1590_v34 }
0x1dfc   :  { %1673 = vrot.lane.b32.xlu0 %v1663_v36, %s1910_s6 }
0x1e6e   :  { %v1674_v40 = vpop.permute.xlu0 %1673 }
0x1e6f   :  { %1773 = vmatmul.msk.f32.vlgmr.msrb.gmra.mxu3 %vm160_vm1, %v1674_v40 }
0x1ef2   :  { %v1694_v42 = vpop.f32.mrf.mxu3 }
0x1ef3   :  { %v1695_v49 = vadd.f32 %v1803_v41, %v1694_v42 }
0x1ef5   :  { %1697 = vst.msk [vmem:[%s2660_s14] sm:$0xff] %vm160_vm1, %v1695_v49 }

</bundles_post_ra>
